<compile_context>
chip_gen: v6e
topology: v6e:2x2x1
jax: 0.10.0
libtpu: 0.0.40
codegen_flags: <defaults>
</compile_context>

<pallas_src>
import functools
import numpy as np
import jax
import jax.numpy as jnp
from jax.experimental import pallas as pl
from jax.experimental.pallas import tpu as pltpu

BN_EPS = 1e-5
LANE = 128
SUBLANE = 8


# ----------------------------- helpers ---------------------------------------
def _round_up(x, m):
    return ((x + m - 1) // m) * m


def _pad_c(c):
    """Pad a channel dim to 128 (lane-dense) if <=2x growth, else to a multiple of 8."""
    c_lane = _round_up(c, LANE)
    return c_lane if c_lane <= 2 * c else _round_up(c, SUBLANE)


def _vmem_limit_bytes():
    """Generation-aware scoped-VMEM limit (~3/4 of physical, capped at 100 MiB)."""
    try:
        cap = int(pltpu.get_tpu_info().vmem_capacity_bytes)
    except Exception:
        cap = 64 * 1024 * 1024
    return int(min(cap * 3 // 4, 100 * 1024 * 1024))


def _resident_spec(block_shape, index_map):
    """BlockSpec for a VMEM-resident (constant index_map) operand, single-buffered."""
    try:
        return pl.BlockSpec(block_shape, index_map, pipeline_mode=pl.Buffered(1))
    except Exception:
        return pl.BlockSpec(block_shape, index_map)


def fold_bn(gamma, beta, mean, var, conv_bias):
    scale = gamma / jnp.sqrt(var + BN_EPS)
    bias = beta + (conv_bias - mean) * scale
    return scale, bias


def _w_taps(w, scale, icp, ocp):
    """PyTorch (oc, ic, 3, 3) conv weight -> (9, icp, ocp) bf16 with BN scale folded in."""
    oc, ic, kh, kw = w.shape
    wt = jnp.transpose(w, (2, 3, 1, 0)).reshape(kh * kw, ic, oc) * scale[None, None, :]
    wt = jnp.pad(wt, ((0, 0), (0, icp - ic), (0, ocp - oc)))
    return wt.astype(jnp.bfloat16)


def _row(b, ocp):
    return jnp.pad(b, (0, ocp - b.shape[0]))[None, :].astype(jnp.float32)


# ----------------------------- Pallas kernel ----------------------------------
def _resblock_kernel(*refs, stride, has_ds, ho, wo):
    if has_ds:
        (x_ref, w1_ref, b1_ref, w2_ref, b2_ref, wid_ref, bid_ref,
         o_ref, y1p_ref) = refs
    else:
        x_ref, w1_ref, b1_ref, w2_ref, b2_ref, o_ref, y1p_ref = refs
        wid_ref = bid_ref = None

    m = ho * wo
    ocp = o_ref.shape[-1]
    cinp = x_ref.shape[-1]

    def x_tap(di, dj):
        # contiguous static slice of the (spatially + channel) padded input image
        if stride == 1:
            slab = x_ref[0, di:di + ho, dj:dj + wo, :]
        else:  # stride 2: parity-split (space-to-depth) input keeps slices contiguous
            rp, ro = di % 2, di // 2
            cp, co = dj % 2, dj // 2
            slab = x_ref[0, rp, cp, ro:ro + ho, co:co + wo, :]
        return slab.reshape(m, cinp)

    # ---- conv1 (3x3, stride) + BN1 (folded into w1/b1) + ReLU, f32 accumulation ----
    acc = jnp.zeros((m, ocp), jnp.float32)
    for di in range(3):
        for dj in range(3):
            acc = acc + jnp.dot(x_tap(di, dj), w1_ref[di * 3 + dj],
                                preferred_element_type=jnp.float32)
    y1 = jnp.maximum(acc + b1_ref[...], 0.0)

    # y1 never leaves VMEM: store bf16 with a zero 1-pixel halo for conv2.
    y1p_ref[...] = jnp.zeros(y1p_ref.shape, y1p_ref.dtype)
    y1p_ref[1:ho + 1, 1:wo + 1, :] = y1.reshape(ho, wo, ocp).astype(y1p_ref.dtype)

    # ---- conv2 (3x3, stride 1) + BN2 (folded into w2/b2) ----
    acc = jnp.zeros((m, ocp), jnp.float32)
    for di in range(3):
        for dj in range(3):
            slab = y1p_ref[di:di + ho, dj:dj + wo, :].reshape(m, ocp)
            acc = acc + jnp.dot(slab, w2_ref[di * 3 + dj],
                                preferred_element_type=jnp.float32)
    y2 = acc + b2_ref[...]

    # ---- shortcut ----
    if has_ds:
        if stride == 1:
            xs = x_ref[0, 1:1 + ho, 1:1 + wo, :].reshape(m, cinp)
        else:
            xs = x_ref[0, 1, 1, 0:ho, 0:wo, :].reshape(m, cinp)
        ident = jnp.dot(xs, wid_ref[...],
                        preferred_element_type=jnp.float32) + bid_ref[...]
    else:
        # in_c == out_c, stride == 1: pure pass-through residual -> f32 VPU add, no dot
        ident = x_ref[0, 1:1 + ho, 1:1 + wo, :].reshape(m, ocp).astype(jnp.float32)

    out = jnp.maximum(y2 + ident, 0.0)
    o_ref[0] = out.reshape(ho, wo, ocp).astype(o_ref.dtype)


# ------------------------------ wrapper ---------------------------------------
def resblock_forward(x_nchw, p, stride):
    assert stride in (1, 2), "only stride 1/2 supported"
    x = jnp.transpose(x_nchw, (0, 2, 3, 1)).astype(jnp.float32)   # NCHW -> NHWC
    n, h, w, in_c = x.shape
    out_c = p['w1'].shape[0]
    cinp, ocp = _pad_c(in_c), _pad_c(out_c)
    ho, wo = (h - 1) // stride + 1, (w - 1) // stride + 1
    has_ds = (stride != 1) or (in_c != out_c)

    # ---- fold BN into bf16 tap weights / f32 biases ----
    s1, b1 = fold_bn(*p['bn1'], p['b1'])
    s2, b2 = fold_bn(*p['bn2'], p['b2'])
    w1 = _w_taps(p['w1'], s1, cinp, ocp)            # (9, cinp, ocp) bf16
    w2 = _w_taps(p['w2'], s2, ocp, ocp)             # (9, ocp,  ocp) bf16
    b1p, b2p = _row(b1, ocp), _row(b2, ocp)         # (1, ocp) f32

    # ---- spatially (+channel) pad input; parity-split (space-to-depth) if stride 2 ----
    xp = jnp.pad(x, ((0, 0), (1, 1), (1, 1), (0, cinp - in_c)))
    if stride == 1:
        x_in = xp.astype(jnp.bfloat16)
        x_block = (1, h + 2, w + 2, cinp)
        x_imap = lambda i: (i, 0, 0, 0)
    else:
        hp, wp = h + 2, w + 2
        hpe, wpe = hp + (hp & 1), wp + (wp & 1)
        xp = jnp.pad(xp, ((0, 0), (0, hpe - hp), (0, wpe - wp), (0, 0)))
        xq = xp.reshape(n, hpe // 2, 2, wpe // 2, 2, cinp).transpose(0, 2, 4, 1, 3, 5)
        x_in = xq.astype(jnp.bfloat16)               # (n, 2, 2, hpe/2, wpe/2, cinp)
        x_block = (1, 2, 2, hpe // 2, wpe // 2, cinp)
        x_imap = lambda i: (i, 0, 0, 0, 0, 0)

    inputs = [x_in, w1, b1p, w2, b2p]
    in_specs = [
        pl.BlockSpec(x_block, x_imap),                               # streamed per image
        _resident_spec((9, cinp, ocp), lambda i: (0, 0, 0)),         # VMEM-resident weights
        _resident_spec((1, ocp), lambda i: (0, 0)),
        _resident_spec((9, ocp, ocp), lambda i: (0, 0, 0)),
        _resident_spec((1, ocp), lambda i: (0, 0)),
    ]
    if has_ds:
        sid, bid = fold_bn(*p['bn_id'], p['id_b'])
        wid = jnp.transpose(p['id_w'][:, :, 0, 0], (1, 0)) * sid[None, :]
        wid = jnp.pad(wid, ((0, cinp - in_c), (0, ocp - out_c))).astype(jnp.bfloat16)
        inputs += [wid, _row(bid, ocp)]
        in_specs += [_resident_spec((cinp, ocp), lambda i: (0, 0)),
                     _resident_spec((1, ocp), lambda i: (0, 0))]

    kernel = functools.partial(_resblock_kernel, stride=stride,
                               has_ds=has_ds, ho=ho, wo=wo)
    flops = 2 * n * ho * wo * ocp * (9 * cinp + 9 * ocp + (cinp if has_ds else 0))
    bytes_accessed = (x_in.size * 2 + (w1.size + w2.size) * 2 + n * ho * wo * ocp * 4)

    out = pl.pallas_call(
        kernel,
        out_shape=jax.ShapeDtypeStruct((n, ho, wo, ocp), jnp.float32),
        grid=(n,),
        in_specs=in_specs,
        out_specs=pl.BlockSpec((1, ho, wo, ocp), lambda i: (i, 0, 0, 0)),
        scratch_shapes=[pltpu.VMEM((ho + 2, wo + 2, ocp), jnp.bfloat16)],
        compiler_params=pltpu.CompilerParams(
            dimension_semantics=("parallel",),
            vmem_limit_bytes=_vmem_limit_bytes()),
        cost_estimate=pl.CostEstimate(flops=int(flops), transcendentals=0,
                                      bytes_accessed=int(bytes_accessed)),
    )(*inputs)

    out = out[..., :out_c]                            # drop padded output lanes
    return jnp.transpose(out, (0, 3, 1, 2))           # NHWC -> NCHW


# ------------------------- params & plain-JAX reference ------------------------
def init_params(key, in_c, out_c, stride):
    ks = jax.random.split(key, 10)

    def conv_w(k, oc, ic, kh, kw):
        bound = 1.0 / np.sqrt(ic * kh * kw)
        return jax.random.uniform(k, (oc, ic, kh, kw), jnp.float32, -bound, bound)

    def conv_b(k, oc, ic, kh, kw):
        bound = 1.0 / np.sqrt(ic * kh * kw)
        return jax.random.uniform(k, (oc,), jnp.float32, -bound, bound)

    def bn(k):
        k1, k2, k3, k4 = jax.random.split(k, 4)
        gamma = jax.random.uniform(k1, (out_c,), jnp.float32, 0.5, 1.5)
        beta = 0.1 * jax.random.normal(k2, (out_c,), jnp.float32)
        mean = 0.1 * jax.random.normal(k3, (out_c,), jnp.float32)
        var = jax.random.uniform(k4, (out_c,), jnp.float32, 0.5, 1.5)
        return gamma, beta, mean, var

    p = {
        'w1': conv_w(ks[0], out_c, in_c, 3, 3), 'b1': conv_b(ks[1], out_c, in_c, 3, 3),
        'bn1': bn(ks[2]),
        'w2': conv_w(ks[3], out_c, out_c, 3, 3), 'b2': conv_b(ks[4], out_c, out_c, 3, 3),
        'bn2': bn(ks[5]),
    }
    if stride != 1 or in_c != out_c:
        p['id_w'] = conv_w(ks[6], out_c, in_c, 1, 1)
        p['id_b'] = conv_b(ks[7], out_c, in_c, 1, 1)
        p['bn_id'] = bn(ks[8])
    else:
        p['id_w'] = None
    return p


def ref_resblock(x, p, stride):
    def conv(x, w, b, s, pad):
        y = jax.lax.conv_general_dilated(
            x, w, (s, s), [(pad, pad), (pad, pad)],
            dimension_numbers=('NCHW', 'OIHW', 'NCHW'),
            precision=jax.lax.Precision.HIGHEST)
        return y + b[None, :, None, None]

    def bn(x, stats):
        g, bta, m, v = stats
        return ((x - m[None, :, None, None]) / jnp.sqrt(v[None, :, None, None] + BN_EPS)
                * g[None, :, None, None] + bta[None, :, None, None])

    out = conv(x, p['w1'], p['b1'], stride, 1)
    out = jnp.maximum(bn(out, p['bn1']), 0.0)
    out = conv(out, p['w2'], p['b2'], 1, 1)
    out = bn(out, p['bn2'])
    if p['id_w'] is not None:
        identity = bn(conv(x, p['id_w'], p['id_b'], stride, 0), p['bn_id'])
    else:
        identity = x
    return jnp.maximum(out + identity, 0.0)


if __name__ == "__main__":
    key = jax.random.PRNGKey(0)

    configs = [
        (4, 8, 2, 16, 16),   # downsample shortcut (matches original test shape)
        (8, 8, 1, 16, 16),   # identity shortcut (stride 1, in_c == out_c)
    ]
    for in_c, out_c, stride, hh, ww in configs:
        kx, kp, key = jax.random.split(key, 3)
        x = jax.random.normal(kx, (2, in_c, hh, ww), jnp.float32)
        params = init_params(kp, in_c, out_c, stride)

        fwd = jax.jit(functools.partial(resblock_forward, stride=stride))
        out = jax.block_until_ready(fwd(x, params))

        ref = jax.block_until_ready(ref_resblock(x, params, stride))
        # bf16 operands with f32 accumulation -> loosened tolerance
        np.testing.assert_allclose(np.asarray(out), np.asarray(ref),
                                   rtol=4e-2, atol=4e-2)
    print("KERNEL_OK")
</pallas_src>

<mosaic_0001>
module attributes {stable_mosaic.version = 11 : i64} {
  func.func @_resblock_kernel(%arg0: i32, %arg1: memref<1x2x2x9x9x8xbf16, #tpu.memory_space<vmem>>, %arg2: memref<9x8x8xbf16, #tpu.memory_space<vmem>>, %arg3: memref<1x8xf32, #tpu.memory_space<vmem>>, %arg4: memref<9x8x8xbf16, #tpu.memory_space<vmem>>, %arg5: memref<1x8xf32, #tpu.memory_space<vmem>>, %arg6: memref<8x8xbf16, #tpu.memory_space<vmem>>, %arg7: memref<1x8xf32, #tpu.memory_space<vmem>>, %arg8: memref<1x8x8x8xf32, #tpu.memory_space<vmem>>, %arg9: memref<10x10x8xbf16, #tpu.memory_space<vmem>>) attributes {dimension_semantics = [#tpu.dimension_semantics<parallel>], iteration_bounds = array<i64: 2>, scalar_prefetch = 0 : i64, scratch_operands = 1 : i64, tpu.core_type = #tpu.core_type<tc>, window_params = [{transform_indices = @transform_0, window_bounds = array<i64: 1, 2, 2, 9, 9, 8>}, {pipeline_mode = #tpu.pipeline_mode<synchronous>, transform_indices = @transform_1, window_bounds = array<i64: 9, 8, 8>}, {pipeline_mode = #tpu.pipeline_mode<synchronous>, transform_indices = @transform_2, window_bounds = array<i64: 1, 8>}, {pipeline_mode = #tpu.pipeline_mode<synchronous>, transform_indices = @transform_3, window_bounds = array<i64: 9, 8, 8>}, {pipeline_mode = #tpu.pipeline_mode<synchronous>, transform_indices = @transform_4, window_bounds = array<i64: 1, 8>}, {pipeline_mode = #tpu.pipeline_mode<synchronous>, transform_indices = @transform_5, window_bounds = array<i64: 8, 8>}, {pipeline_mode = #tpu.pipeline_mode<synchronous>, transform_indices = @transform_6, window_bounds = array<i64: 1, 8>}, {transform_indices = @transform_7, window_bounds = array<i64: 1, 8, 8, 8>}]} {
    %cst = arith.constant 0.000000e+00 : f32
    %0 = vector.broadcast %cst : f32 to vector<64x8xf32>
    %c0 = arith.constant 0 : index
    %c0_0 = arith.constant 0 : index
    %c0_1 = arith.constant 0 : index
    %c0_2 = arith.constant 0 : index
    %c0_3 = arith.constant 0 : index
    %c0_4 = arith.constant 0 : index
    %1 = vector.load %arg1[%c0, %c0_0, %c0_1, %c0_2, %c0_3, %c0_4] : memref<1x2x2x9x9x8xbf16, #tpu.memory_space<vmem>>, vector<1x1x1x8x8x8xbf16>
    %2 = vector.shape_cast %1 : vector<1x1x1x8x8x8xbf16> to vector<8x8x8xbf16>
    %3 = vector.shape_cast %2 : vector<8x8x8xbf16> to vector<64x8xbf16>
    %c0_5 = arith.constant 0 : index
    %c0_6 = arith.constant 0 : index
    %c0_7 = arith.constant 0 : index
    %4 = vector.load %arg2[%c0_5, %c0_6, %c0_7] : memref<9x8x8xbf16, #tpu.memory_space<vmem>>, vector<1x8x8xbf16>
    %5 = vector.shape_cast %4 : vector<1x8x8xbf16> to vector<8x8xbf16>
    %cst_8 = arith.constant dense<0.000000e+00> : vector<64x8xf32>
    %6 = tpu.matmul %3, %5, %cst_8 {dimension_numbers = #tpu.dot_dimension_numbers<[1], [0], [0], [1], [0, 0, 1, 1], [], []>} : vector<64x8xbf16>, vector<8x8xbf16>, vector<64x8xf32> -> vector<64x8xf32>
    %7 = arith.addf %0, %6 : vector<64x8xf32>
    %c0_9 = arith.constant 0 : index
    %c0_10 = arith.constant 0 : index
    %c1 = arith.constant 1 : index
    %c0_11 = arith.constant 0 : index
    %c0_12 = arith.constant 0 : index
    %c0_13 = arith.constant 0 : index
    %8 = vector.load %arg1[%c0_9, %c0_10, %c1, %c0_11, %c0_12, %c0_13] : memref<1x2x2x9x9x8xbf16, #tpu.memory_space<vmem>>, vector<1x1x1x8x8x8xbf16>
    %9 = vector.shape_cast %8 : vector<1x1x1x8x8x8xbf16> to vector<8x8x8xbf16>
    %10 = vector.shape_cast %9 : vector<8x8x8xbf16> to vector<64x8xbf16>
    %c1_14 = arith.constant 1 : index
    %c0_15 = arith.constant 0 : index
    %c0_16 = arith.constant 0 : index
    %11 = vector.load %arg2[%c1_14, %c0_15, %c0_16] : memref<9x8x8xbf16, #tpu.memory_space<vmem>>, vector<1x8x8xbf16>
    %12 = vector.shape_cast %11 : vector<1x8x8xbf16> to vector<8x8xbf16>
    %cst_17 = arith.constant dense<0.000000e+00> : vector<64x8xf32>
    %13 = tpu.matmul %10, %12, %cst_17 {dimension_numbers = #tpu.dot_dimension_numbers<[1], [0], [0], [1], [0, 0, 1, 1], [], []>} : vector<64x8xbf16>, vector<8x8xbf16>, vector<64x8xf32> -> vector<64x8xf32>
    %14 = arith.addf %7, %13 : vector<64x8xf32>
    %c0_18 = arith.constant 0 : index
    %c0_19 = arith.constant 0 : index
    %c0_20 = arith.constant 0 : index
    %c0_21 = arith.constant 0 : index
    %c1_22 = arith.constant 1 : index
    %c0_23 = arith.constant 0 : index
    %15 = vector.load %arg1[%c0_18, %c0_19, %c0_20, %c0_21, %c1_22, %c0_23] : memref<1x2x2x9x9x8xbf16, #tpu.memory_space<vmem>>, vector<1x1x1x8x8x8xbf16>
    %16 = vector.shape_cast %15 : vector<1x1x1x8x8x8xbf16> to vector<8x8x8xbf16>
    %17 = vector.shape_cast %16 : vector<8x8x8xbf16> to vector<64x8xbf16>
    %c2 = arith.constant 2 : index
    %c0_24 = arith.constant 0 : index
    %c0_25 = arith.constant 0 : index
    %18 = vector.load %arg2[%c2, %c0_24, %c0_25] : memref<9x8x8xbf16, #tpu.memory_space<vmem>>, vector<1x8x8xbf16>
    %19 = vector.shape_cast %18 : vector<1x8x8xbf16> to vector<8x8xbf16>
    %cst_26 = arith.constant dense<0.000000e+00> : vector<64x8xf32>
    %20 = tpu.matmul %17, %19, %cst_26 {dimension_numbers = #tpu.dot_dimension_numbers<[1], [0], [0], [1], [0, 0, 1, 1], [], []>} : vector<64x8xbf16>, vector<8x8xbf16>, vector<64x8xf32> -> vector<64x8xf32>
    %21 = arith.addf %14, %20 : vector<64x8xf32>
    %c0_27 = arith.constant 0 : index
    %c1_28 = arith.constant 1 : index
    %c0_29 = arith.constant 0 : index
    %c0_30 = arith.constant 0 : index
    %c0_31 = arith.constant 0 : index
    %c0_32 = arith.constant 0 : index
    %22 = vector.load %arg1[%c0_27, %c1_28, %c0_29, %c0_30, %c0_31, %c0_32] : memref<1x2x2x9x9x8xbf16, #tpu.memory_space<vmem>>, vector<1x1x1x8x8x8xbf16>
    %23 = vector.shape_cast %22 : vector<1x1x1x8x8x8xbf16> to vector<8x8x8xbf16>
    %24 = vector.shape_cast %23 : vector<8x8x8xbf16> to vector<64x8xbf16>
    %c3 = arith.constant 3 : index
    %c0_33 = arith.constant 0 : index
    %c0_34 = arith.constant 0 : index
    %25 = vector.load %arg2[%c3, %c0_33, %c0_34] : memref<9x8x8xbf16, #tpu.memory_space<vmem>>, vector<1x8x8xbf16>
    %26 = vector.shape_cast %25 : vector<1x8x8xbf16> to vector<8x8xbf16>
    %cst_35 = arith.constant dense<0.000000e+00> : vector<64x8xf32>
    %27 = tpu.matmul %24, %26, %cst_35 {dimension_numbers = #tpu.dot_dimension_numbers<[1], [0], [0], [1], [0, 0, 1, 1], [], []>} : vector<64x8xbf16>, vector<8x8xbf16>, vector<64x8xf32> -> vector<64x8xf32>
    %28 = arith.addf %21, %27 : vector<64x8xf32>
    %c0_36 = arith.constant 0 : index
    %c1_37 = arith.constant 1 : index
    %c1_38 = arith.constant 1 : index
    %c0_39 = arith.constant 0 : index
    %c0_40 = arith.constant 0 : index
    %c0_41 = arith.constant 0 : index
    %29 = vector.load %arg1[%c0_36, %c1_37, %c1_38, %c0_39, %c0_40, %c0_41] : memref<1x2x2x9x9x8xbf16, #tpu.memory_space<vmem>>, vector<1x1x1x8x8x8xbf16>
    %30 = vector.shape_cast %29 : vector<1x1x1x8x8x8xbf16> to vector<8x8x8xbf16>
    %31 = vector.shape_cast %30 : vector<8x8x8xbf16> to vector<64x8xbf16>
    %c4 = arith.constant 4 : index
    %c0_42 = arith.constant 0 : index
    %c0_43 = arith.constant 0 : index
    %32 = vector.load %arg2[%c4, %c0_42, %c0_43] : memref<9x8x8xbf16, #tpu.memory_space<vmem>>, vector<1x8x8xbf16>
    %33 = vector.shape_cast %32 : vector<1x8x8xbf16> to vector<8x8xbf16>
    %cst_44 = arith.constant dense<0.000000e+00> : vector<64x8xf32>
    %34 = tpu.matmul %31, %33, %cst_44 {dimension_numbers = #tpu.dot_dimension_numbers<[1], [0], [0], [1], [0, 0, 1, 1], [], []>} : vector<64x8xbf16>, vector<8x8xbf16>, vector<64x8xf32> -> vector<64x8xf32>
    %35 = arith.addf %28, %34 : vector<64x8xf32>
    %c0_45 = arith.constant 0 : index
    %c1_46 = arith.constant 1 : index
    %c0_47 = arith.constant 0 : index
    %c0_48 = arith.constant 0 : index
    %c1_49 = arith.constant 1 : index
    %c0_50 = arith.constant 0 : index
    %36 = vector.load %arg1[%c0_45, %c1_46, %c0_47, %c0_48, %c1_49, %c0_50] : memref<1x2x2x9x9x8xbf16, #tpu.memory_space<vmem>>, vector<1x1x1x8x8x8xbf16>
    %37 = vector.shape_cast %36 : vector<1x1x1x8x8x8xbf16> to vector<8x8x8xbf16>
    %38 = vector.shape_cast %37 : vector<8x8x8xbf16> to vector<64x8xbf16>
    %c5 = arith.constant 5 : index
    %c0_51 = arith.constant 0 : index
    %c0_52 = arith.constant 0 : index
    %39 = vector.load %arg2[%c5, %c0_51, %c0_52] : memref<9x8x8xbf16, #tpu.memory_space<vmem>>, vector<1x8x8xbf16>
    %40 = vector.shape_cast %39 : vector<1x8x8xbf16> to vector<8x8xbf16>
    %cst_53 = arith.constant dense<0.000000e+00> : vector<64x8xf32>
    %41 = tpu.matmul %38, %40, %cst_53 {dimension_numbers = #tpu.dot_dimension_numbers<[1], [0], [0], [1], [0, 0, 1, 1], [], []>} : vector<64x8xbf16>, vector<8x8xbf16>, vector<64x8xf32> -> vector<64x8xf32>
    %42 = arith.addf %35, %41 : vector<64x8xf32>
    %c0_54 = arith.constant 0 : index
    %c0_55 = arith.constant 0 : index
    %c0_56 = arith.constant 0 : index
    %c1_57 = arith.constant 1 : index
    %c0_58 = arith.constant 0 : index
    %c0_59 = arith.constant 0 : index
    %43 = vector.load %arg1[%c0_54, %c0_55, %c0_56, %c1_57, %c0_58, %c0_59] : memref<1x2x2x9x9x8xbf16, #tpu.memory_space<vmem>>, vector<1x1x1x8x8x8xbf16>
    %44 = vector.shape_cast %43 : vector<1x1x1x8x8x8xbf16> to vector<8x8x8xbf16>
    %45 = vector.shape_cast %44 : vector<8x8x8xbf16> to vector<64x8xbf16>
    %c6 = arith.constant 6 : index
    %c0_60 = arith.constant 0 : index
    %c0_61 = arith.constant 0 : index
    %46 = vector.load %arg2[%c6, %c0_60, %c0_61] : memref<9x8x8xbf16, #tpu.memory_space<vmem>>, vector<1x8x8xbf16>
    %47 = vector.shape_cast %46 : vector<1x8x8xbf16> to vector<8x8xbf16>
    %cst_62 = arith.constant dense<0.000000e+00> : vector<64x8xf32>
    %48 = tpu.matmul %45, %47, %cst_62 {dimension_numbers = #tpu.dot_dimension_numbers<[1], [0], [0], [1], [0, 0, 1, 1], [], []>} : vector<64x8xbf16>, vector<8x8xbf16>, vector<64x8xf32> -> vector<64x8xf32>
    %49 = arith.addf %42, %48 : vector<64x8xf32>
    %c0_63 = arith.constant 0 : index
    %c0_64 = arith.constant 0 : index
    %c1_65 = arith.constant 1 : index
    %c1_66 = arith.constant 1 : index
    %c0_67 = arith.constant 0 : index
    %c0_68 = arith.constant 0 : index
    %50 = vector.load %arg1[%c0_63, %c0_64, %c1_65, %c1_66, %c0_67, %c0_68] : memref<1x2x2x9x9x8xbf16, #tpu.memory_space<vmem>>, vector<1x1x1x8x8x8xbf16>
    %51 = vector.shape_cast %50 : vector<1x1x1x8x8x8xbf16> to vector<8x8x8xbf16>
    %52 = vector.shape_cast %51 : vector<8x8x8xbf16> to vector<64x8xbf16>
    %c7 = arith.constant 7 : index
    %c0_69 = arith.constant 0 : index
    %c0_70 = arith.constant 0 : index
    %53 = vector.load %arg2[%c7, %c0_69, %c0_70] : memref<9x8x8xbf16, #tpu.memory_space<vmem>>, vector<1x8x8xbf16>
    %54 = vector.shape_cast %53 : vector<1x8x8xbf16> to vector<8x8xbf16>
    %cst_71 = arith.constant dense<0.000000e+00> : vector<64x8xf32>
    %55 = tpu.matmul %52, %54, %cst_71 {dimension_numbers = #tpu.dot_dimension_numbers<[1], [0], [0], [1], [0, 0, 1, 1], [], []>} : vector<64x8xbf16>, vector<8x8xbf16>, vector<64x8xf32> -> vector<64x8xf32>
    %56 = arith.addf %49, %55 : vector<64x8xf32>
    %c0_72 = arith.constant 0 : index
    %c0_73 = arith.constant 0 : index
    %c0_74 = arith.constant 0 : index
    %c1_75 = arith.constant 1 : index
    %c1_76 = arith.constant 1 : index
    %c0_77 = arith.constant 0 : index
    %57 = vector.load %arg1[%c0_72, %c0_73, %c0_74, %c1_75, %c1_76, %c0_77] : memref<1x2x2x9x9x8xbf16, #tpu.memory_space<vmem>>, vector<1x1x1x8x8x8xbf16>
    %58 = vector.shape_cast %57 : vector<1x1x1x8x8x8xbf16> to vector<8x8x8xbf16>
    %59 = vector.shape_cast %58 : vector<8x8x8xbf16> to vector<64x8xbf16>
    %c8 = arith.constant 8 : index
    %c0_78 = arith.constant 0 : index
    %c0_79 = arith.constant 0 : index
    %60 = vector.load %arg2[%c8, %c0_78, %c0_79] : memref<9x8x8xbf16, #tpu.memory_space<vmem>>, vector<1x8x8xbf16>
    %61 = vector.shape_cast %60 : vector<1x8x8xbf16> to vector<8x8xbf16>
    %cst_80 = arith.constant dense<0.000000e+00> : vector<64x8xf32>
    %62 = tpu.matmul %59, %61, %cst_80 {dimension_numbers = #tpu.dot_dimension_numbers<[1], [0], [0], [1], [0, 0, 1, 1], [], []>} : vector<64x8xbf16>, vector<8x8xbf16>, vector<64x8xf32> -> vector<64x8xf32>
    %63 = arith.addf %56, %62 : vector<64x8xf32>
    %c0_81 = arith.constant 0 : index
    %c0_82 = arith.constant 0 : index
    %64 = vector.load %arg3[%c0_81, %c0_82] : memref<1x8xf32, #tpu.memory_space<vmem>>, vector<1x8xf32>
    %65 = vector.broadcast %64 : vector<1x8xf32> to vector<64x8xf32>
    %66 = arith.addf %63, %65 : vector<64x8xf32>
    %cst_83 = arith.constant 0.000000e+00 : f32
    %67 = vector.broadcast %cst_83 : f32 to vector<64x8xf32>
    %68 = arith.maximumf %66, %67 : vector<64x8xf32>
    %cst_84 = arith.constant 0.000000e+00 : bf16
    %69 = vector.broadcast %cst_84 : bf16 to vector<10x10x8xbf16>
    %c0_85 = arith.constant 0 : index
    %c0_86 = arith.constant 0 : index
    %c0_87 = arith.constant 0 : index
    %70 = vector.load %arg9[%c0_85, %c0_86, %c0_87] : memref<10x10x8xbf16, #tpu.memory_space<vmem>>, vector<10x10x8xbf16>
    tpu.vector_store %arg9[%c0_85, %c0_86, %c0_87], %69 {strides = array<i32>} : memref<10x10x8xbf16, #tpu.memory_space<vmem>>, vector<10x10x8xbf16>,
    %71 = vector.shape_cast %68 : vector<64x8xf32> to vector<8x8x8xf32>
    %72 = arith.truncf %71 : vector<8x8x8xf32> to vector<8x8x8xbf16>
    %c1_88 = arith.constant 1 : index
    %c1_89 = arith.constant 1 : index
    %c0_90 = arith.constant 0 : index
    %73 = vector.load %arg9[%c1_88, %c1_89, %c0_90] : memref<10x10x8xbf16, #tpu.memory_space<vmem>>, vector<8x8x8xbf16>
    tpu.vector_store %arg9[%c1_88, %c1_89, %c0_90], %72 {strides = array<i32>} : memref<10x10x8xbf16, #tpu.memory_space<vmem>>, vector<8x8x8xbf16>,
    %cst_91 = arith.constant 0.000000e+00 : f32
    %74 = vector.broadcast %cst_91 : f32 to vector<64x8xf32>
    %c0_92 = arith.constant 0 : index
    %c0_93 = arith.constant 0 : index
    %c0_94 = arith.constant 0 : index
    %75 = vector.load %arg9[%c0_92, %c0_93, %c0_94] : memref<10x10x8xbf16, #tpu.memory_space<vmem>>, vector<8x8x8xbf16>
    %76 = vector.shape_cast %75 : vector<8x8x8xbf16> to vector<64x8xbf16>
    %c0_95 = arith.constant 0 : index
    %c0_96 = arith.constant 0 : index
    %c0_97 = arith.constant 0 : index
    %77 = vector.load %arg4[%c0_95, %c0_96, %c0_97] : memref<9x8x8xbf16, #tpu.memory_space<vmem>>, vector<1x8x8xbf16>
    %78 = vector.shape_cast %77 : vector<1x8x8xbf16> to vector<8x8xbf16>
    %cst_98 = arith.constant dense<0.000000e+00> : vector<64x8xf32>
    %79 = tpu.matmul %76, %78, %cst_98 {dimension_numbers = #tpu.dot_dimension_numbers<[1], [0], [0], [1], [0, 0, 1, 1], [], []>} : vector<64x8xbf16>, vector<8x8xbf16>, vector<64x8xf32> -> vector<64x8xf32>
    %80 = arith.addf %74, %79 : vector<64x8xf32>
    %c0_99 = arith.constant 0 : index
    %c1_100 = arith.constant 1 : index
    %c0_101 = arith.constant 0 : index
    %81 = vector.load %arg9[%c0_99, %c1_100, %c0_101] : memref<10x10x8xbf16, #tpu.memory_space<vmem>>, vector<8x8x8xbf16>
    %82 = vector.shape_cast %81 : vector<8x8x8xbf16> to vector<64x8xbf16>
    %c1_102 = arith.constant 1 : index
    %c0_103 = arith.constant 0 : index
    %c0_104 = arith.constant 0 : index
    %83 = vector.load %arg4[%c1_102, %c0_103, %c0_104] : memref<9x8x8xbf16, #tpu.memory_space<vmem>>, vector<1x8x8xbf16>
    %84 = vector.shape_cast %83 : vector<1x8x8xbf16> to vector<8x8xbf16>
    %cst_105 = arith.constant dense<0.000000e+00> : vector<64x8xf32>
    %85 = tpu.matmul %82, %84, %cst_105 {dimension_numbers = #tpu.dot_dimension_numbers<[1], [0], [0], [1], [0, 0, 1, 1], [], []>} : vector<64x8xbf16>, vector<8x8xbf16>, vector<64x8xf32> -> vector<64x8xf32>
    %86 = arith.addf %80, %85 : vector<64x8xf32>
    %c0_106 = arith.constant 0 : index
    %c2_107 = arith.constant 2 : index
    %c0_108 = arith.constant 0 : index
    %87 = vector.load %arg9[%c0_106, %c2_107, %c0_108] : memref<10x10x8xbf16, #tpu.memory_space<vmem>>, vector<8x8x8xbf16>
    %88 = vector.shape_cast %87 : vector<8x8x8xbf16> to vector<64x8xbf16>
    %c2_109 = arith.constant 2 : index
    %c0_110 = arith.constant 0 : index
    %c0_111 = arith.constant 0 : index
    %89 = vector.load %arg4[%c2_109, %c0_110, %c0_111] : memref<9x8x8xbf16, #tpu.memory_space<vmem>>, vector<1x8x8xbf16>
    %90 = vector.shape_cast %89 : vector<1x8x8xbf16> to vector<8x8xbf16>
    %cst_112 = arith.constant dense<0.000000e+00> : vector<64x8xf32>
    %91 = tpu.matmul %88, %90, %cst_112 {dimension_numbers = #tpu.dot_dimension_numbers<[1], [0], [0], [1], [0, 0, 1, 1], [], []>} : vector<64x8xbf16>, vector<8x8xbf16>, vector<64x8xf32> -> vector<64x8xf32>
    %92 = arith.addf %86, %91 : vector<64x8xf32>
    %c1_113 = arith.constant 1 : index
    %c0_114 = arith.constant 0 : index
    %c0_115 = arith.constant 0 : index
    %93 = vector.load %arg9[%c1_113, %c0_114, %c0_115] : memref<10x10x8xbf16, #tpu.memory_space<vmem>>, vector<8x8x8xbf16>
    %94 = vector.shape_cast %93 : vector<8x8x8xbf16> to vector<64x8xbf16>
    %c3_116 = arith.constant 3 : index
    %c0_117 = arith.constant 0 : index
    %c0_118 = arith.constant 0 : index
    %95 = vector.load %arg4[%c3_116, %c0_117, %c0_118] : memref<9x8x8xbf16, #tpu.memory_space<vmem>>, vector<1x8x8xbf16>
    %96 = vector.shape_cast %95 : vector<1x8x8xbf16> to vector<8x8xbf16>
    %cst_119 = arith.constant dense<0.000000e+00> : vector<64x8xf32>
    %97 = tpu.matmul %94, %96, %cst_119 {dimension_numbers = #tpu.dot_dimension_numbers<[1], [0], [0], [1], [0, 0, 1, 1], [], []>} : vector<64x8xbf16>, vector<8x8xbf16>, vector<64x8xf32> -> vector<64x8xf32>
    %98 = arith.addf %92, %97 : vector<64x8xf32>
    %c1_120 = arith.constant 1 : index
    %c1_121 = arith.constant 1 : index
    %c0_122 = arith.constant 0 : index
    %99 = vector.load %arg9[%c1_120, %c1_121, %c0_122] : memref<10x10x8xbf16, #tpu.memory_space<vmem>>, vector<8x8x8xbf16>
    %100 = vector.shape_cast %99 : vector<8x8x8xbf16> to vector<64x8xbf16>
    %c4_123 = arith.constant 4 : index
    %c0_124 = arith.constant 0 : index
    %c0_125 = arith.constant 0 : index
    %101 = vector.load %arg4[%c4_123, %c0_124, %c0_125] : memref<9x8x8xbf16, #tpu.memory_space<vmem>>, vector<1x8x8xbf16>
    %102 = vector.shape_cast %101 : vector<1x8x8xbf16> to vector<8x8xbf16>
    %cst_126 = arith.constant dense<0.000000e+00> : vector<64x8xf32>
    %103 = tpu.matmul %100, %102, %cst_126 {dimension_numbers = #tpu.dot_dimension_numbers<[1], [0], [0], [1], [0, 0, 1, 1], [], []>} : vector<64x8xbf16>, vector<8x8xbf16>, vector<64x8xf32> -> vector<64x8xf32>
    %104 = arith.addf %98, %103 : vector<64x8xf32>
    %c1_127 = arith.constant 1 : index
    %c2_128 = arith.constant 2 : index
    %c0_129 = arith.constant 0 : index
    %105 = vector.load %arg9[%c1_127, %c2_128, %c0_129] : memref<10x10x8xbf16, #tpu.memory_space<vmem>>, vector<8x8x8xbf16>
    %106 = vector.shape_cast %105 : vector<8x8x8xbf16> to vector<64x8xbf16>
    %c5_130 = arith.constant 5 : index
    %c0_131 = arith.constant 0 : index
    %c0_132 = arith.constant 0 : index
    %107 = vector.load %arg4[%c5_130, %c0_131, %c0_132] : memref<9x8x8xbf16, #tpu.memory_space<vmem>>, vector<1x8x8xbf16>
    %108 = vector.shape_cast %107 : vector<1x8x8xbf16> to vector<8x8xbf16>
    %cst_133 = arith.constant dense<0.000000e+00> : vector<64x8xf32>
    %109 = tpu.matmul %106, %108, %cst_133 {dimension_numbers = #tpu.dot_dimension_numbers<[1], [0], [0], [1], [0, 0, 1, 1], [], []>} : vector<64x8xbf16>, vector<8x8xbf16>, vector<64x8xf32> -> vector<64x8xf32>
    %110 = arith.addf %104, %109 : vector<64x8xf32>
    %c2_134 = arith.constant 2 : index
    %c0_135 = arith.constant 0 : index
    %c0_136 = arith.constant 0 : index
    %111 = vector.load %arg9[%c2_134, %c0_135, %c0_136] : memref<10x10x8xbf16, #tpu.memory_space<vmem>>, vector<8x8x8xbf16>
    %112 = vector.shape_cast %111 : vector<8x8x8xbf16> to vector<64x8xbf16>
    %c6_137 = arith.constant 6 : index
    %c0_138 = arith.constant 0 : index
    %c0_139 = arith.constant 0 : index
    %113 = vector.load %arg4[%c6_137, %c0_138, %c0_139] : memref<9x8x8xbf16, #tpu.memory_space<vmem>>, vector<1x8x8xbf16>
    %114 = vector.shape_cast %113 : vector<1x8x8xbf16> to vector<8x8xbf16>
    %cst_140 = arith.constant dense<0.000000e+00> : vector<64x8xf32>
    %115 = tpu.matmul %112, %114, %cst_140 {dimension_numbers = #tpu.dot_dimension_numbers<[1], [0], [0], [1], [0, 0, 1, 1], [], []>} : vector<64x8xbf16>, vector<8x8xbf16>, vector<64x8xf32> -> vector<64x8xf32>
    %116 = arith.addf %110, %115 : vector<64x8xf32>
    %c2_141 = arith.constant 2 : index
    %c1_142 = arith.constant 1 : index
    %c0_143 = arith.constant 0 : index
    %117 = vector.load %arg9[%c2_141, %c1_142, %c0_143] : memref<10x10x8xbf16, #tpu.memory_space<vmem>>, vector<8x8x8xbf16>
    %118 = vector.shape_cast %117 : vector<8x8x8xbf16> to vector<64x8xbf16>
    %c7_144 = arith.constant 7 : index
    %c0_145 = arith.constant 0 : index
    %c0_146 = arith.constant 0 : index
    %119 = vector.load %arg4[%c7_144, %c0_145, %c0_146] : memref<9x8x8xbf16, #tpu.memory_space<vmem>>, vector<1x8x8xbf16>
    %120 = vector.shape_cast %119 : vector<1x8x8xbf16> to vector<8x8xbf16>
    %cst_147 = arith.constant dense<0.000000e+00> : vector<64x8xf32>
    %121 = tpu.matmul %118, %120, %cst_147 {dimension_numbers = #tpu.dot_dimension_numbers<[1], [0], [0], [1], [0, 0, 1, 1], [], []>} : vector<64x8xbf16>, vector<8x8xbf16>, vector<64x8xf32> -> vector<64x8xf32>
    %122 = arith.addf %116, %121 : vector<64x8xf32>
    %c2_148 = arith.constant 2 : index
    %c2_149 = arith.constant 2 : index
    %c0_150 = arith.constant 0 : index
    %123 = vector.load %arg9[%c2_148, %c2_149, %c0_150] : memref<10x10x8xbf16, #tpu.memory_space<vmem>>, vector<8x8x8xbf16>
    %124 = vector.shape_cast %123 : vector<8x8x8xbf16> to vector<64x8xbf16>
    %c8_151 = arith.constant 8 : index
    %c0_152 = arith.constant 0 : index
    %c0_153 = arith.constant 0 : index
    %125 = vector.load %arg4[%c8_151, %c0_152, %c0_153] : memref<9x8x8xbf16, #tpu.memory_space<vmem>>, vector<1x8x8xbf16>
    %126 = vector.shape_cast %125 : vector<1x8x8xbf16> to vector<8x8xbf16>
    %cst_154 = arith.constant dense<0.000000e+00> : vector<64x8xf32>
    %127 = tpu.matmul %124, %126, %cst_154 {dimension_numbers = #tpu.dot_dimension_numbers<[1], [0], [0], [1], [0, 0, 1, 1], [], []>} : vector<64x8xbf16>, vector<8x8xbf16>, vector<64x8xf32> -> vector<64x8xf32>
    %128 = arith.addf %122, %127 : vector<64x8xf32>
    %c0_155 = arith.constant 0 : index
    %c0_156 = arith.constant 0 : index
    %129 = vector.load %arg5[%c0_155, %c0_156] : memref<1x8xf32, #tpu.memory_space<vmem>>, vector<1x8xf32>
    %130 = vector.broadcast %129 : vector<1x8xf32> to vector<64x8xf32>
    %131 = arith.addf %128, %130 : vector<64x8xf32>
    %c0_157 = arith.constant 0 : index
    %c1_158 = arith.constant 1 : index
    %c1_159 = arith.constant 1 : index
    %c0_160 = arith.constant 0 : index
    %c0_161 = arith.constant 0 : index
    %c0_162 = arith.constant 0 : index
    %132 = vector.load %arg1[%c0_157, %c1_158, %c1_159, %c0_160, %c0_161, %c0_162] : memref<1x2x2x9x9x8xbf16, #tpu.memory_space<vmem>>, vector<1x1x1x8x8x8xbf16>
    %133 = vector.shape_cast %132 : vector<1x1x1x8x8x8xbf16> to vector<8x8x8xbf16>
    %134 = vector.shape_cast %133 : vector<8x8x8xbf16> to vector<64x8xbf16>
    %c0_163 = arith.constant 0 : index
    %c0_164 = arith.constant 0 : index
    %135 = vector.load %arg6[%c0_163, %c0_164] : memref<8x8xbf16, #tpu.memory_space<vmem>>, vector<8x8xbf16>
    %cst_165 = arith.constant dense<0.000000e+00> : vector<64x8xf32>
    %136 = tpu.matmul %134, %135, %cst_165 {dimension_numbers = #tpu.dot_dimension_numbers<[1], [0], [0], [1], [0, 0, 1, 1], [], []>} : vector<64x8xbf16>, vector<8x8xbf16>, vector<64x8xf32> -> vector<64x8xf32>
    %c0_166 = arith.constant 0 : index
    %c0_167 = arith.constant 0 : index
    %137 = vector.load %arg7[%c0_166, %c0_167] : memref<1x8xf32, #tpu.memory_space<vmem>>, vector<1x8xf32>
    %138 = vector.broadcast %137 : vector<1x8xf32> to vector<64x8xf32>
    %139 = arith.addf %136, %138 : vector<64x8xf32>
    %140 = arith.addf %131, %139 : vector<64x8xf32>
    %cst_168 = arith.constant 0.000000e+00 : f32
    %141 = vector.broadcast %cst_168 : f32 to vector<64x8xf32>
    %142 = arith.maximumf %140, %141 : vector<64x8xf32>
    %143 = vector.shape_cast %142 : vector<64x8xf32> to vector<8x8x8xf32>
    %c0_169 = arith.constant 0 : index
    %c0_170 = arith.constant 0 : index
    %c0_171 = arith.constant 0 : index
    %c0_172 = arith.constant 0 : index
    %144 = vector.load %arg8[%c0_169, %c0_170, %c0_171, %c0_172] : memref<1x8x8x8xf32, #tpu.memory_space<vmem>>, vector<1x8x8x8xf32>
    %145 = vector.shape_cast %144 : vector<1x8x8x8xf32> to vector<8x8x8xf32>
    %146 = vector.shape_cast %143 : vector<8x8x8xf32> to vector<1x8x8x8xf32>
    tpu.vector_store %arg8[%c0_169, %c0_170, %c0_171, %c0_172], %146 {strides = array<i32>} : memref<1x8x8x8xf32, #tpu.memory_space<vmem>>, vector<1x8x8x8xf32>,
    return
  }
  func.func @transform_0(%arg0: i32) -> (i32, i32, i32, i32, i32, i32) {
    %c0_i32 = arith.constant 0 : i32
    %c0_i32_0 = arith.constant 0 : i32
    %c0_i32_1 = arith.constant 0 : i32
    %c0_i32_2 = arith.constant 0 : i32
    %c0_i32_3 = arith.constant 0 : i32
    %c0_i32_4 = arith.constant 0 : i32
    return %arg0, %c0_i32, %c0_i32_0, %c0_i32_1, %c0_i32_2, %c0_i32_3 : i32, i32, i32, i32, i32, i32
  }
  func.func @transform_1(%arg0: i32) -> (i32, i32, i32) {
    %c0_i32 = arith.constant 0 : i32
    %c0_i32_0 = arith.constant 0 : i32
    %c0_i32_1 = arith.constant 0 : i32
    %c0_i32_2 = arith.constant 0 : i32
    return %c0_i32, %c0_i32_0, %c0_i32_1 : i32, i32, i32
  }
  func.func @transform_2(%arg0: i32) -> (i32, i32) {
    %c0_i32 = arith.constant 0 : i32
    %c0_i32_0 = arith.constant 0 : i32
    %c0_i32_1 = arith.constant 0 : i32
    return %c0_i32, %c0_i32_0 : i32, i32
  }
  func.func @transform_3(%arg0: i32) -> (i32, i32, i32) {
    %c0_i32 = arith.constant 0 : i32
    %c0_i32_0 = arith.constant 0 : i32
    %c0_i32_1 = arith.constant 0 : i32
    %c0_i32_2 = arith.constant 0 : i32
    return %c0_i32, %c0_i32_0, %c0_i32_1 : i32, i32, i32
  }
  func.func @transform_4(%arg0: i32) -> (i32, i32) {
    %c0_i32 = arith.constant 0 : i32
    %c0_i32_0 = arith.constant 0 : i32
    %c0_i32_1 = arith.constant 0 : i32
    return %c0_i32, %c0_i32_0 : i32, i32
  }
  func.func @transform_5(%arg0: i32) -> (i32, i32) {
    %c0_i32 = arith.constant 0 : i32
    %c0_i32_0 = arith.constant 0 : i32
    %c0_i32_1 = arith.constant 0 : i32
    return %c0_i32, %c0_i32_0 : i32, i32
  }
  func.func @transform_6(%arg0: i32) -> (i32, i32) {
    %c0_i32 = arith.constant 0 : i32
    %c0_i32_0 = arith.constant 0 : i32
    %c0_i32_1 = arith.constant 0 : i32
    return %c0_i32, %c0_i32_0 : i32, i32
  }
  func.func @transform_7(%arg0: i32) -> (i32, i32, i32, i32) {
    %c0_i32 = arith.constant 0 : i32
    %c0_i32_0 = arith.constant 0 : i32
    %c0_i32_1 = arith.constant 0 : i32
    %c0_i32_2 = arith.constant 0 : i32
    return %arg0, %c0_i32, %c0_i32_0, %c0_i32_1 : i32, i32, i32, i32
  }
}

</mosaic_0001>

<bundles_post_ra>
// kernel: resblock_forward.1
= control target key start
LH: loop header
LB: loop body
LE: loop exit
PB: predicated region body
PF: predicated region fallthrough
CT: control target
= control target key end

     0   :  { %s4298_s24 = smov 0   ;;  %s5208_s0 = inlined_call_operand.vmem [shape: bf16[2,2,2,9,9,8], index: 0, kind: input, shape index: {}]   ;;  %s5209_s1 = inlined_call_operand.vmem [shape: bf16[9,8,8], index: 1, kind: input, shape index: {}]   ;;  %s5210_s2 = inlined_call_operand.vmem [shape: f32[1,8], index: 2, kind: input, shape index: {}]   ;;  %s5211_s3 = inlined_call_operand.vmem [shape: bf16[9,8,8], index: 3, kind: input, shape index: {}]   ;;  %s5212_s4 = inlined_call_operand.vmem [shape: f32[1,8], index: 4, kind: input, shape index: {}]   ;;  %s5213_s5 = inlined_call_operand.vmem [shape: bf16[8,8], index: 5, kind: input, shape index: {}]   ;;  %s5214_s6 = inlined_call_operand.vmem [shape: f32[1,8], index: 6, kind: input, shape index: {}]   ;;  %s5215_s7 = inlined_call_operand.vmem [shape: f32[2,8,8,8], index: 7, kind: output, shape index: {}]  }
   0x1 LB: > { %s3590_s25 = sadd.s32 4294967295, %s4255_s24   ;;  %p3594_p0 = scmp.ge.s32.totalorder %s4255_s24, 1  ;;  %s4255_s24 = sphi %s4298_s24, %s17_s24  }
   0x2   : > { %p237_p1 = scmp.lt.s32.totalorder %s4255_s24, 3 }
   0x4   : > { %p238_p2 = pnand %p3594_p0, %p237_p1 }
   0x6   : > { %241 = sbr.rel (%p238_p2) target bundleno = 616 (0x268), region = 48 }
   0xb   : > { %v3606_v0 = vld [vmem:[%s5209_s1 + $0x4] sm:$0xf]  ;;  %vm333_vm0 = vcmask 1043456   ;;  %p269_p3 = scmp.lt.s32.totalorder %s3590_s25, 1  ;;  %v288_v2 = vld [vmem:[%s5209_s1] sm:$0xf] }
   0xc   : > { %4180 = vmatprep.subr.msk.bf16.mxu1 %vm333_vm0, %v3606_v0  ;;  %4179 = vmatprep.subr.msk.bf16.mxu0 %vm333_vm0, %v3606_v0  ;;  %v335_v1 = vsel %vm333_vm0, %v3606_v0, 0  ;;  %v3623_v3 = vld [vmem:[%s5209_s1 + $0x8] sm:$0xf]  ;;  %vm320_vm1 = vcmask 64512   ;;  %v435_v4 = vsel %vm333_vm0, %v288_v2, 0  ;;  %vm1694_vm5 = vcmask 60416  }
   0xd   : > { %4178 = vmatpush3.bf16.msra.mxu1 %v335_v1  ;;  %3988 = vmatpush3.bf16.msra.mxu0 %v335_v1  ;;  %s5240_s25 = smov (!%p269_p3, %s3590_s25), 1  ;;  %v660_v5 = vsel %vm333_vm0, %v3623_v3, 0  ;;  %v3640_v7 = vld [vmem:[%s5209_s1 + $0xc] sm:$0xf]  ;;  %v3657_v8 = vld [vmem:[%s5209_s1 + $0x10] sm:$0xf] }
   0xe   : > { %4181 = vmatprep.subr.msk.bf16.mxu1 %vm333_vm0, %v288_v2  ;;  %4182 = vmatprep.subr.msk.bf16.mxu0 %vm333_vm0, %v3623_v3  ;;  %s4199_s9 = smul.u32 288, %s5240_s25  ;;  %vm518_vm2 = vsmask.f32 3328  ;;  %vm519_vm3 = vsmask.f32 7440  ;;  %v779_v13 = vsel %vm333_vm0, %v3640_v7, 0 }
   0xf   : > { %v4347_v14 = vsel %vm333_vm0, %v3657_v8, 0  ;;  %v4364_v38 = vld [vmem:[%s5209_s1 + $0x14] sm:$0xf]  ;;  %vm4368_vm4 = vmor %vm518_vm2, %vm519_vm3  ;;  %vm1696_vm6 = vcmask 57344   ;;  %vm2230_vm7 = vcmask 1042432   ;;  %vm2231_vm8 = vcmask 1046532  }
  0x10   : > { %s4326_s12 = scalar_lea.vmem %s5208_s0, %s4199_s9  ;;  %vm1830_vm9 = vsmask.f32 7938  ;;  %vm4653_vm10 = vmor %vm2230_vm7, %vm2231_vm8  ;;  %vm1836_vm11 = vsmask.f32 256  ;;  %s3883_s9 = sshll.u32 %s5240_s25, 6 }
  0x11   : > { %v4209_v6 = vld [vmem:[%s4326_s12 + $0x48] ss:$8 sps:$4 sm:$0xff]   ;;  %v4211_v10 = vld [vmem:[%s4326_s12 + $0x58] ss:$8 sps:$4 sm:$0xff]   ;;  %v503_v16 = vld [vmem:[%s4326_s12 + $0x4] sm:$0x1]  ;;  %s5171_s11 = scalar_lea.vmem %s5215_s7, %s3883_s9 }
  0x12   : > { %v4210_v9 = vld [vmem:[%s4326_s12 + $0x68] ss:$8 sps:$4 sm:$0xff]   ;;  %3989 = vmatprep.mubr.msk.bf16.mxu0 %vm320_vm1, %v4209_v6  ;;  %v4212_v11 = vld [vmem:[%s4326_s12 + $0x78] ss:$8 sps:$4 sm:$0xff]   ;;  %v505_v19 = vld [vmem:[%s4326_s12 + $0xc] sm:$0x1] }
  0x13   : > { %3993 = vmatprep.mubr.msk.bf16.mxu1 %vm320_vm1, %v4210_v9  ;;  %3990 = vmatmul.mubr.msk.bf16.vlgmr.msra.gmra.mxu0 %vm320_vm1, %v4211_v10  ;;  %v4213_v12 = vld [vmem:[%s4326_s12] ss:$8 sps:$4 sm:$0xff]   ;;  %v4214_v18 = vld [vmem:[%s4326_s12 + $0x10] ss:$8 sps:$4 sm:$0xff]   ;;  %v531_v22 = vshll.u32 %v503_v16, 16  ;;  %v545_v25 = vshll.u32 %v505_v19, 16  ;;  %vm4706_vm12 = vmand %vm1694_vm5, %vm1830_vm9 }
  0x14   : > { %3994 = vmatmul.mubr.msk.bf16.vlgmr.msra.gmra.mxu1 %vm320_vm1, %v4212_v11  ;;  %4008 = vmatpush3.bf16.msra.mxu0 %v660_v5  ;;  %v502_v15 = vld [vmem:[%s4326_s12] sm:$0xf]  ;;  %v504_v17 = vld [vmem:[%s4326_s12 + $0x8] sm:$0xf]  ;;  %v506_v26 = vld [vmem:[%s4326_s12 + $0x10] sm:$0xf] }
  0x15   : > { %3998 = vmatpush3.bf16.msra.mxu1 %v435_v4  ;;  %3999 = vmatprep.mubr.msk.bf16.mxu1 %vm320_vm1, %v4213_v12  ;;  %v522_v20 = vshrl.u32 %v502_v15, 16  ;;  %v525_v21 = vshll.u32 %v502_v15, 16  ;;  %v536_v23 = vshrl.u32 %v504_v17, 16  ;;  %v539_v24 = vshll.u32 %v504_v17, 16  ;;  %v507_v27 = vld [vmem:[%s4326_s12 + $0x14] sm:$0x1]  ;;  %vm4712_vm13 = vmand %vm1696_vm6, %vm1836_vm11 }
  0x16   : > { %4183 = vmatprep.subr.msk.bf16.mxu1 %vm333_vm0, %v3640_v7  ;;  %4184 = vmatprep.subr.msk.bf16.mxu0 %vm333_vm0, %v3657_v8  ;;  %v533_v30 = vrot.slane %v531_v22, 5  ;;  %v508_v32 = vld [vmem:[%s4326_s12 + $0x18] sm:$0xf]  ;;  %v547_v34 = vrot.slane %v545_v25, 5  ;;  %v509_v35 = vld [vmem:[%s4326_s12 + $0x1c] sm:$0x1] }
  0x17   : > { %v524_v28 = vrot.slane %v522_v20, 4  ;;  %v527_v29 = vrot.slane %v525_v21, 5  ;;  %v538_v31 = vrot.slane %v536_v23, 4  ;;  %v541_v33 = vrot.slane %v539_v24, 5  ;;  %v4215_v52 = vld [vmem:[%s4326_s12 + $0x20] ss:$8 sps:$4 sm:$0xff]  }
  0x18   : > { %v550_v36 = vshrl.u32 %v506_v26, 16  ;;  %v553_v37 = vshll.u32 %v506_v26, 16  ;;  %v559_v40 = vshll.u32 %v507_v27, 16  ;;  %v564_v41 = vshrl.u32 %v508_v32, 16  ;;  %v4216_v58 = vld [vmem:[%s4326_s12 + $0x30] ss:$8 sps:$4 sm:$0xff]  }
  0x19   : > { %v528_v39 = vor.u32 %v527_v29, %v524_v28  ;;  %v567_v42 = vshll.u32 %v508_v32, 16  ;;  %v542_v44 = vor.u32 %v541_v33, %v538_v31  ;;  %v573_v47 = vshll.u32 %v509_v35, 16  ;;  %v510_v59 = vld [vmem:[%s4326_s12 + $0x20] sm:$0xf]  ;;  %v511_v60 = vld [vmem:[%s4326_s12 + $0x24] sm:$0x1] }
  0x1a   : > { %v552_v45 = vrot.slane %v550_v36, 4  ;;  %v555_v46 = vrot.slane %v553_v37, 5  ;;  %v561_v49 = vrot.slane %v559_v40, 5  ;;  %v566_v50 = vrot.slane %v564_v41, 4  ;;  %v512_v63 = vld [vmem:[%s4326_s12 + $0x28] sm:$0xf] }
  0x1b   : > { %v529_v48 = vrot.slane %v528_v39, 4  ;;  %v569_v51 = vrot.slane %v567_v42, 5  ;;  %v543_v53 = vrot.slane %v542_v44, 4  ;;  %v575_v55 = vrot.slane %v573_v47, 5  ;;  %v513_v0 = vld [vmem:[%s4326_s12 + $0x2c] sm:$0x1] }
  0x1c   : > { %4000 = vmatmul.mubr.msk.bf16.vlgmr.msra.gmra.mxu1 %vm320_vm1, %v4214_v18  ;;  %v556_v54 = vor.u32 %v555_v46, %v552_v45  ;;  %v578_v1 = vshrl.u32 %v510_v59, 16  ;;  %v581_v4 = vshll.u32 %v510_v59, 16  ;;  %v587_v5 = vshll.u32 %v511_v60, 16  ;;  %v514_v6 = vld [vmem:[%s4326_s12 + $0x30] sm:$0xf] }
  0x1d   : > { %4018 = vmatpush3.bf16.msra.mxu1 %v779_v13  ;;  %v534_v56 = vsel %vm4368_vm4, %v529_v48, %v533_v30  ;;  %v570_v57 = vor.u32 %v569_v51, %v566_v50  ;;  %4003 = vmatprep.mubr.msk.bf16.mxu1 %vm320_vm1, %v4215_v52  ;;  %v548_v61 = vsel %vm4368_vm4, %v543_v53, %v547_v34  ;;  %v592_v9 = vshrl.u32 %v512_v63, 16  ;;  %v515_v11 = vld [vmem:[%s4326_s12 + $0x34] sm:$0x1]  ;;  %v516_v17 = vld [vmem:[%s4326_s12 + $0x38] sm:$0xf] }
  0x1e   : > { %4185 = vmatprep.subr.msk.bf16.mxu1 %vm333_vm0, %v4364_v38  ;;  %v557_v62 = vrot.slane %v556_v54, 4  ;;  %v3624_v2 = vcombine.low %v534_v56, %v548_v61  ;;  %v580_v8 = vrot.slane %v578_v1, 4  ;;  %v595_v10 = vshll.u32 %v512_v63, 16  ;;  %v3699_v18 = vld [vmem:[%s5209_s1 + $0x18] sm:$0xf] }
  0x1f   : > { %v571_v3 = vrot.slane %v570_v57, 4  ;;  %v583_v13 = vrot.slane %v581_v4, 5  ;;  %v589_v15 = vrot.slane %v587_v5, 5  ;;  %v601_v16 = vshll.u32 %v513_v0, 16  ;;  %v517_v22 = vld [vmem:[%s4326_s12 + $0x3c] sm:$0x1] }
  0x20   : > { %v562_v7 = vsel %vm4368_vm4, %v557_v62, %v561_v49  ;;  %4009 = vmatprep.mubr.msk.bf16.mxu0 %vm320_vm1, %v3624_v2  ;;  %v594_v20 = vrot.slane %v592_v9, 4  ;;  %v597_v21 = vrot.slane %v595_v10, 5  ;;  %v606_v23 = vshrl.u32 %v514_v6, 16  ;;  %v4217_v35 = vld [vmem:[%s4326_s12 + $0x90] ss:$8 sps:$4 sm:$0xff]  }
  0x21   : > { %v576_v12 = vsel %vm4368_vm4, %v571_v3, %v575_v55  ;;  %v584_v24 = vor.u32 %v583_v13, %v580_v8  ;;  %v603_v25 = vrot.slane %v601_v16, 5  ;;  %v609_v26 = vshll.u32 %v514_v6, 16  ;;  %v4218_v44 = vld [vmem:[%s4326_s12 + $0xa0] ss:$8 sps:$4 sm:$0xff]   ;;  %v3716_v51 = vld [vmem:[%s5209_s1 + $0x1c] sm:$0xf] }
  0x22   : > { %v3625_v19 = vcombine.low %v562_v7, %v576_v12  ;;  %v615_v27 = vshll.u32 %v515_v11, 16  ;;  %v598_v28 = vor.u32 %v597_v21, %v594_v20  ;;  %v608_v29 = vrot.slane %v606_v23, 4  ;;  %v4221_v53 = vld [vmem:[%s4326_s12 + $0xb0] ss:$8 sps:$4 sm:$0xff]   ;;  %v4222_v57 = vld [vmem:[%s4326_s12 + $0xc0] ss:$8 sps:$4 sm:$0xff]  }
  0x23   : > { %v620_v30 = vshrl.u32 %v516_v17, 16  ;;  %v623_v31 = vshll.u32 %v516_v17, 16  ;;  %v585_v32 = vrot.slane %v584_v24, 4  ;;  %v611_v33 = vrot.slane %v609_v26, 5  ;;  %v3667_v59 = vld [vmem:[%s4326_s12 + $0x94] sm:$0x1] }
  0x24   : > { %4004 = vmatmul.mubr.msk.bf16.gmra.mxu1 %vm320_vm1, %v4216_v58  ;;  %4010 = vmatmul.mubr.msk.bf16.vlgmr.msra.gmra.mxu0 %vm320_vm1, %v3625_v19  ;;  %v629_v34 = vshll.u32 %v517_v22, 16  ;;  %v599_v36 = vrot.slane %v598_v28, 4  ;;  %v617_v42 = vrot.slane %v615_v27, 5  ;;  %v1128_v49 = vsel %vm333_vm0, %v4364_v38, 0  ;;  %v4219_v38 = vld [vmem:[%s4326_s12 + $0xd8] ss:$8 sps:$4 sm:$0xff]  }
  0x25   : > { %4028 = vmatpush3.bf16.msra.mxu0 %v4347_v14  ;;  %v622_v37 = vrot.slane %v620_v30, 4  ;;  %v625_v39 = vrot.slane %v623_v31, 5  ;;  %v590_v40 = vsel %vm4368_vm4, %v585_v32, %v589_v15  ;;  %v612_v41 = vor.u32 %v611_v33, %v608_v29  ;;  %4019 = vmatprep.mubr.msk.bf16.mxu1 %vm320_vm1, %v4217_v35  ;;  %v3666_v58 = vld [vmem:[%s4326_s12 + $0x90] sm:$0xf]  ;;  %v3668_v60 = vld [vmem:[%s4326_s12 + $0x98] sm:$0xf] }
  0x26   : > { %4186 = vmatprep.subr.msk.bf16.mxu0 %vm333_vm0, %v3699_v18  ;;  %v604_v14 = vsel %vm4368_vm4, %v599_v36, %v603_v25  ;;  %v631_v46 = vrot.slane %v629_v34, 5  ;;  %v1247_v56 = vsel %vm333_vm0, %v3699_v18, 0  ;;  %v3669_v61 = vld [vmem:[%s4326_s12 + $0x9c] sm:$0x1]  ;;  %v990_v62 = vshrl.u32 %v3666_v58, 16 }
  0x27   : > { %v626_v45 = vor.u32 %v625_v39, %v622_v37  ;;  %v3626_v47 = vcombine.low %v590_v40, %v604_v14  ;;  %v613_v48 = vrot.slane %v612_v41, 4  ;;  %v993_v63 = vshll.u32 %v3666_v58, 16  ;;  %v3670_v2 = vld [vmem:[%s4326_s12 + $0xa0] sm:$0xf]  ;;  %v4220_v3 = vld [vmem:[%s4326_s12 + $0xe8] ss:$8 sps:$4 sm:$0xff]  }
  0x28   : > { %v999_v0 = vshll.u32 %v3667_v59, 16  ;;  %v1004_v1 = vshrl.u32 %v3668_v60, 16  ;;  %v1007_v4 = vshll.u32 %v3668_v60, 16  ;;  %v1013_v5 = vshll.u32 %v3669_v61, 16  ;;  %v3671_v6 = vld [vmem:[%s4326_s12 + $0xa4] sm:$0x1] }
  0x29   : > { %v627_v50 = vrot.slane %v626_v45, 4  ;;  %4013 = vmatprep.mubr.msk.bf16.mxu0 %vm320_vm1, %v3626_v47  ;;  %v618_v52 = vsel %vm4368_vm4, %v613_v48, %v617_v42  ;;  %v3672_v7 = vld [vmem:[%s4326_s12 + $0xa8] sm:$0xf]  ;;  %v4223_v8 = vld [vmem:[%s4326_s12 + $0xf8] ss:$8 sps:$4 sm:$0xff]   ;;  %v992_v9 = vrot.slane %v990_v62, 4 }
  0x2a   : > { %v995_v10 = vrot.slane %v993_v63, 5  ;;  %v1001_v11 = vrot.slane %v999_v0, 5  ;;  %v1006_v12 = vrot.slane %v1004_v1, 4  ;;  %v3673_v13 = vld [vmem:[%s4326_s12 + $0xac] sm:$0x1]  ;;  %v1009_v15 = vrot.slane %v1007_v4, 5 }
  0x2b   : > { %v632_v54 = vsel %vm4368_vm4, %v627_v50, %v631_v46  ;;  %v1015_v16 = vrot.slane %v1013_v5, 5  ;;  %v1018_v17 = vshrl.u32 %v3670_v2, 16  ;;  %v1021_v18 = vshll.u32 %v3670_v2, 16  ;;  %v4442_v27 = vld [vmem:[%s5209_s1 + $0x20] sm:$0xf] }
  0x2c   : > { %4020 = vmatmul.mubr.msk.bf16.vlgmr.msra.gmra.mxu1 %vm320_vm1, %v4218_v44  ;;  %v3627_v55 = vcombine.low %v618_v52, %v632_v54  ;;  %v996_v19 = vor.u32 %v995_v10, %v992_v9  ;;  %v1027_v20 = vshll.u32 %v3671_v6, 16  ;;  %v1032_v21 = vshrl.u32 %v3672_v7, 16  ;;  %v3674_v39 = vld [vmem:[%s4326_s12 + $0xb0] sm:$0xf]  ;;  %v3675_v40 = vld [vmem:[%s4326_s12 + $0xb4] sm:$0x1] }
  0x2d   : > { %4038 = vmatpush3.bf16.msra.mxu1 %v1128_v49  ;;  %4023 = vmatprep.mubr.msk.bf16.mxu1 %vm320_vm1, %v4221_v53  ;;  %v1035_v22 = vshll.u32 %v3672_v7, 16  ;;  %v1010_v23 = vor.u32 %v1009_v15, %v1006_v12  ;;  %v1020_v24 = vrot.slane %v1018_v17, 4  ;;  %v1023_v25 = vrot.slane %v1021_v18, 5  ;;  %v3676_v41 = vld [vmem:[%s4326_s12 + $0xb8] sm:$0xf] }
  0x2e   : > { %4187 = vmatprep.subr.msk.bf16.mxu1 %vm333_vm0, %v3716_v51  ;;  %4014 = vmatmul.mubr.msk.bf16.gmra.mxu0 %vm320_vm1, %v3627_v55  ;;  %v1041_v26 = vshll.u32 %v3673_v13, 16  ;;  %v997_v28 = vrot.slane %v996_v19, 4  ;;  %v1034_v29 = vrot.slane %v1032_v21, 4  ;;  %v1366_v31 = vsel %vm333_vm0, %v3716_v51, 0  ;;  %v4224_v42 = vld [vmem:[%s4326_s12 + $0x108] ss:$8 sps:$4 sm:$0xff]  }
  0x2f   : > { %4029 = vmatprep.mubr.msk.bf16.mxu0 %vm320_vm1, %v4219_v38  ;;  %v1037_v30 = vrot.slane %v1035_v22, 5  ;;  %v1011_v32 = vrot.slane %v1010_v23, 4  ;;  %v1024_v33 = vor.u32 %v1023_v25, %v1020_v24  ;;  %v1029_v34 = vrot.slane %v1027_v20, 5  ;;  %v3677_v45 = vld [vmem:[%s4326_s12 + $0xbc] sm:$0x1] }
  0x30   : > { %v1043_v35 = vrot.slane %v1041_v26, 5  ;;  %v1002_v36 = vsel %vm4368_vm4, %v997_v28, %v1001_v11  ;;  %v1046_v46 = vshrl.u32 %v3674_v39, 16  ;;  %v1049_v47 = vshll.u32 %v3674_v39, 16  ;;  %v4225_v50 = vld [vmem:[%s4326_s12 + $0x8] ss:$8 sps:$4 sm:$0xff]  }
  0x31   : > { %v1038_v37 = vor.u32 %v1037_v30, %v1034_v29  ;;  %v1016_v44 = vsel %vm4368_vm4, %v1011_v32, %v1015_v16  ;;  %v1025_v14 = vrot.slane %v1024_v33, 4  ;;  %v1055_v51 = vshll.u32 %v3675_v40, 16  ;;  %v3678_v53 = vld [vmem:[%s4326_s12 + $0xc0] sm:$0xf]  ;;  %v3680_v62 = vld [vmem:[%s4326_s12 + $0xc8] sm:$0xf] }
  0x32   : > { %v3683_v48 = vcombine.low %v1002_v36, %v1016_v44  ;;  %v1060_v52 = vshrl.u32 %v3676_v41, 16  ;;  %v1048_v38 = vrot.slane %v1046_v46, 4  ;;  %v1051_v55 = vrot.slane %v1049_v47, 5  ;;  %v3681_v2 = vld [vmem:[%s4326_s12 + $0xcc] sm:$0x1] }
  0x33   : > { %v1039_v49 = vrot.slane %v1038_v37, 4  ;;  %v1030_v54 = vsel %vm4368_vm4, %v1025_v14, %v1029_v34  ;;  %v1057_v59 = vrot.slane %v1055_v51, 5  ;;  %v1069_v61 = vshll.u32 %v3677_v45, 16  ;;  %v4226_v16 = vld [vmem:[%s4326_s12 + $0x18] ss:$8 sps:$4 sm:$0xff]  }
  0x34   : > { %4024 = vmatmul.mubr.msk.bf16.gmra.mxu1 %vm320_vm1, %v4222_v57  ;;  %v3679_v57 = vld [vmem:[%s4326_s12 + $0xc4] sm:$0x1]  ;;  %v1062_v60 = vrot.slane %v1060_v52, 4  ;;  %v1052_v0 = vor.u32 %v1051_v55, %v1048_v38  ;;  %v1077_v5 = vshll.u32 %v3678_v53, 16  ;;  %v1088_v7 = vshrl.u32 %v3680_v62, 16 }
  0x35   : > { %4039 = vmatprep.mubr.msk.bf16.mxu1 %vm320_vm1, %v3683_v48  ;;  %v1044_v58 = vsel %vm4368_vm4, %v1039_v49, %v1043_v35  ;;  %v1071_v4 = vrot.slane %v1069_v61, 5  ;;  %v1083_v6 = vshll.u32 %v3679_v57, 16  ;;  %v1091_v11 = vshll.u32 %v3680_v62, 16  ;;  %v4227_v29 = vld [vmem:[%s4326_s12 + $0x28] ss:$8 sps:$4 sm:$0xff]  }
  0x36   : > { %4030 = vmatmul.mubr.msk.bf16.vlgmr.msra.gmra.mxu0 %vm320_vm1, %v4220_v3  ;;  %v3684_v63 = vcombine.low %v1030_v54, %v1044_v58  ;;  %v1074_v3 = vshrl.u32 %v3678_v53, 16  ;;  %v1079_v12 = vrot.slane %v1077_v5, 5  ;;  %v1090_v13 = vrot.slane %v1088_v7, 4  ;;  %v3725_v30 = vld [vmem:[%s4326_s12 + $0x8] sm:$0xf] }
  0x37   : > { %4048 = vmatpush3.bf16.msra.mxu0 %v1247_v56  ;;  %4033 = vmatprep.mubr.msk.bf16.mxu0 %vm320_vm1, %v4223_v8  ;;  %v1063_v56 = vshll.u32 %v3676_v41, 16  ;;  %v1053_v8 = vrot.slane %v1052_v0, 4  ;;  %v1097_v15 = vshll.u32 %v3681_v2, 16  ;;  %v1093_v19 = vrot.slane %v1091_v11, 5  ;;  %v4229_v32 = vld [vmem:[%s4326_s12 + $0x50] ss:$8 sps:$4 sm:$0xff]  }
  0x38   : > { %4188 = vmatprep.subr.msk.bf16.mxu0 %vm333_vm0, %v4442_v27  ;;  %v1076_v10 = vrot.slane %v1074_v3, 4  ;;  %v1085_v21 = vrot.slane %v1083_v6, 5  ;;  %v1596_v25 = vsel %vm333_vm0, %v4442_v27, 0  ;;  %v3726_v33 = vld [vmem:[%s4326_s12 + $0xc] sm:$0x1]  ;;  %v1458_v35 = vshrl.u32 %v3725_v30, 16 }
  0x39   : > { %v1065_v1 = vrot.slane %v1063_v56, 5  ;;  %v1058_v17 = vsel %vm4368_vm4, %v1053_v8, %v1057_v59  ;;  %v1094_v23 = vor.u32 %v1093_v19, %v1090_v13  ;;  %v1099_v24 = vrot.slane %v1097_v15, 5  ;;  %v3727_v34 = vld [vmem:[%s4326_s12 + $0x10] sm:$0xf]  ;;  %v3728_v37 = vld [vmem:[%s4326_s12 + $0x14] sm:$0x1] }
  0x3a   : > { %v1080_v20 = vor.u32 %v1079_v12, %v1076_v10  ;;  %v1461_v39 = vshll.u32 %v3725_v30, 16  ;;  %v1467_v27 = vshll.u32 %v3726_v33, 16  ;;  %v1472_v40 = vshrl.u32 %v3727_v34, 16  ;;  %v3729_v45 = vld [vmem:[%s4326_s12 + $0x18] sm:$0xf] }
  0x3b   : > { %v1066_v9 = vor.u32 %v1065_v1, %v1062_v60  ;;  %v1475_v44 = vshll.u32 %v3727_v34, 16  ;;  %v1481_v14 = vshll.u32 %v3728_v37, 16  ;;  %v4228_v51 = vld [vmem:[%s4326_s12 + $0x38] ss:$8 sps:$4 sm:$0xff]   ;;  %v3732_v38 = vld [vmem:[%s4326_s12 + $0x24] sm:$0x1] }
  0x3c   : > { %4040 = vmatmul.mubr.msk.bf16.vlgmr.msra.gmra.mxu1 %vm320_vm1, %v3684_v63  ;;  %v1081_v28 = vrot.slane %v1080_v20, 4  ;;  %v1463_v47 = vrot.slane %v1461_v39, 5  ;;  %v1469_v48 = vrot.slane %v1467_v27, 5  ;;  %v1474_v49 = vrot.slane %v1472_v40, 4  ;;  %v3731_v54 = vld [vmem:[%s4326_s12 + $0x20] sm:$0xf] }
  0x3d   : > { %4058 = vmatpush3.bf16.msra.mxu1 %v1366_v31  ;;  %v1067_v18 = vrot.slane %v1066_v9, 4  ;;  %v1095_v31 = vrot.slane %v1094_v23, 4  ;;  %v1477_v52 = vrot.slane %v1475_v44, 5  ;;  %v1483_v53 = vrot.slane %v1481_v14, 5  ;;  %v4230_v63 = vld [vmem:[%s4326_s12 + $0x60] ss:$8 sps:$4 sm:$0xff]  }
  0x3e   : > { %4034 = vmatmul.mubr.msk.bf16.gmra.mxu0 %vm320_vm1, %v4224_v42  ;;  %v1086_v36 = vsel %vm4368_vm4, %v1081_v28, %v1085_v21  ;;  %v1460_v42 = vrot.slane %v1458_v35, 4  ;;  %v1486_v56 = vshrl.u32 %v3729_v45, 16  ;;  %v1489_v57 = vshll.u32 %v3729_v45, 16  ;;  %v4231_v6 = vld [vmem:[%s4326_s12 + $0x70] ss:$8 sps:$4 sm:$0xff]  }
  0x3f   : > { %4049 = vmatprep.mubr.msk.bf16.mxu0 %vm320_vm1, %v4225_v50  ;;  %v1072_v22 = vsel %vm4368_vm4, %v1067_v18, %v1071_v4  ;;  %v1100_v41 = vsel %vm4368_vm4, %v1095_v31, %v1099_v24  ;;  %v3730_v50 = vld [vmem:[%s4326_s12 + $0x1c] sm:$0x1]  ;;  %v1478_v59 = vor.u32 %v1477_v52, %v1474_v49  ;;  %v1500_v60 = vshrl.u32 %v3731_v54, 16  ;;  %v3733_v11 = vld [vmem:[%s4326_s12 + $0x28] sm:$0xf] }
  0x40   : > { %v3685_v26 = vcombine.low %v1058_v17, %v1072_v22  ;;  %v3686_v46 = vcombine.low %v1086_v36, %v1100_v41  ;;  %v1464_v55 = vor.u32 %v1463_v47, %v1460_v42  ;;  %v1495_v58 = vshll.u32 %v3730_v50, 16  ;;  %v3734_v15 = vld [vmem:[%s4326_s12 + $0x2c] sm:$0x1]  ;;  %v3736_v17 = vld [vmem:[%s4326_s12 + $0x34] sm:$0x1] }
  0x41   : > { %v1503_v61 = vshll.u32 %v3731_v54, 16  ;;  %v1509_v62 = vshll.u32 %v3732_v38, 16  ;;  %v1488_v1 = vrot.slane %v1486_v56, 4  ;;  %v1491_v2 = vrot.slane %v1489_v57, 5  ;;  %v3737_v22 = vld [vmem:[%s4326_s12 + $0x38] sm:$0xf] }
  0x42   : > { %4043 = vmatprep.mubr.msk.bf16.mxu1 %vm320_vm1, %v3685_v26  ;;  %v1465_v0 = vrot.slane %v1464_v55, 4  ;;  %v1479_v3 = vrot.slane %v1478_v59, 4  ;;  %v1502_v4 = vrot.slane %v1500_v60, 4  ;;  %v1497_v9 = vrot.slane %v1495_v58, 5  ;;  %v3738_v28 = vld [vmem:[%s4326_s12 + $0x3c] sm:$0x1] }
  0x43   : > { %v1505_v5 = vrot.slane %v1503_v61, 5  ;;  %v1492_v8 = vor.u32 %v1491_v2, %v1488_v1  ;;  %v1511_v10 = vrot.slane %v1509_v62, 5  ;;  %v1514_v20 = vshrl.u32 %v3733_v11, 16  ;;  %v3739_v33 = vld [vmem:[%s4326_s12 + $0x40] sm:$0xf] }
  0x44   : > { %4044 = vmatmul.mubr.msk.bf16.gmra.mxu1 %vm320_vm1, %v3686_v46  ;;  %v1470_v7 = vsel %vm4368_vm4, %v1465_v0, %v1469_v48  ;;  %v1484_v12 = vsel %vm4368_vm4, %v1479_v3, %v1483_v53  ;;  %v1517_v21 = vshll.u32 %v3733_v11, 16  ;;  %v1523_v24 = vshll.u32 %v3734_v15, 16  ;;  %v3740_v39 = vld [vmem:[%s4326_s12 + $0x44] sm:$0x1]  ;;  %v4232_v40 = vld [vmem:[%s4326_s12 + $0x80] ss:$8 sps:$4 sm:$0xff]  }
  0x45   : > { %4059 = vmatprep.mubr.msk.bf16.mxu1 %vm320_vm1, %v4229_v32  ;;  %v1506_v13 = vor.u32 %v1505_v5, %v1502_v4  ;;  %v3742_v18 = vcombine.low %v1470_v7, %v1484_v12  ;;  %v1493_v19 = vrot.slane %v1492_v8, 4  ;;  %v1516_v30 = vrot.slane %v1514_v20, 4  ;;  %v1891_v4 = vld [vmem:[%s5211_s3] sm:$0xf]  ;;  %v4566_v8 = vld [vmem:[%s5211_s3 + $0x8] sm:$0xf] }
  0x46   : > { %4050 = vmatmul.mubr.msk.bf16.vlgmr.msra.gmra.mxu0 %vm320_vm1, %v4226_v16  ;;  %v3735_v16 = vld [vmem:[%s4326_s12 + $0x30] sm:$0xf]  ;;  %v1519_v31 = vrot.slane %v1517_v21, 5  ;;  %v1537_v32 = vshll.u32 %v3736_v17, 16  ;;  %v1525_v35 = vrot.slane %v1523_v24, 5  ;;  %v1542_v44 = vshrl.u32 %v3737_v22, 16 }
  0x47   : > { %4068 = vmatpush3.bf16.msra.mxu0 %v1596_v25  ;;  %4053 = vmatprep.mubr.msk.bf16.mxu0 %vm320_vm1, %v4227_v29  ;;  %v1507_v23 = vrot.slane %v1506_v13, 4  ;;  %v1528_v25 = vshrl.u32 %v3735_v16, 16  ;;  %v1531_v26 = vshll.u32 %v3735_v16, 16  ;;  %v1498_v29 = vsel %vm4368_vm4, %v1493_v19, %v1497_v9  ;;  %v4573_v9 = vld [vmem:[%s5211_s3 + $0xc] sm:$0xf] }
  0x48   : > { %v1520_v41 = vor.u32 %v1519_v31, %v1516_v30  ;;  %v1539_v42 = vrot.slane %v1537_v32, 5  ;;  %v1545_v45 = vshll.u32 %v3737_v22, 16  ;;  %v1551_v46 = vshll.u32 %v3738_v28, 16  ;;  %4190 = vmatprep.subr.msk.bf16.mxu0 %vm333_vm0, %v1891_v4 }
  0x49   : > { %v1512_v34 = vsel %vm4368_vm4, %v1507_v23, %v1511_v10  ;;  %v1530_v36 = vrot.slane %v1528_v25, 4  ;;  %v1533_v37 = vrot.slane %v1531_v26, 5  ;;  %v1556_v47 = vshrl.u32 %v3739_v33, 16 }
  0x4a   : > { %v3743_v27 = vcombine.low %v1498_v29, %v1512_v34  ;;  %v1521_v48 = vrot.slane %v1520_v41, 4  ;;  %v1544_v49 = vrot.slane %v1542_v44, 4  ;;  %v1559_v50 = vshll.u32 %v3739_v33, 16 }
  0x4b   : > { %v1534_v14 = vor.u32 %v1533_v37, %v1530_v36  ;;  %v1547_v53 = vrot.slane %v1545_v45, 5  ;;  %v1558_v54 = vrot.slane %v1556_v47, 4  ;;  %v1553_v58 = vrot.slane %v1551_v46, 5 }
  0x4c   : > { %4060 = vmatmul.mubr.msk.bf16.vlgmr.msra.gmra.mxu1 %vm320_vm1, %v4230_v63  ;;  %v1526_v38 = vsel %vm4368_vm4, %v1521_v48, %v1525_v35  ;;  %v1561_v55 = vrot.slane %v1559_v50, 5  ;;  %v4257_v3 = vmov 0   ;;  %v2139_v5 = vsel %vm333_vm0, %v1891_v4, 0 }
  0x4d   : > { %4063 = vmatprep.mubr.msk.bf16.mxu1 %vm320_vm1, %v4231_v6  ;;  %v1535_v52 = vrot.slane %v1534_v14, 4  ;;  %v1548_v57 = vor.u32 %v1547_v53, %v1544_v49  ;;  %1702 = vst.msk [vmem:[#allocation2 + $0x18] sm:$0xf] %vm1694_vm5, %v4257_v3  ;;  %1695 = vst.msk [vmem:[#allocation2] sm:$0xf] %vm1694_vm5, %v4257_v3 }
  0x4e   : > { %4054 = vmatmul.mubr.msk.bf16.gmra.mxu0 %vm320_vm1, %v4228_v51  ;;  %v1565_v51 = vshll.u32 %v3740_v39, 16  ;;  %v1562_v60 = vor.u32 %v1561_v55, %v1558_v54  ;;  %1703 = vst.msk [vmem:[#allocation2 + $0x1c] sm:$0x1] %vm1696_vm6, %v4257_v3  ;;  %1697 = vst.msk [vmem:[#allocation2 + $0x4] sm:$0x1] %vm1696_vm6, %v4257_v3 }
  0x4f   : > { %4069 = vmatprep.mubr.msk.bf16.mxu0 %vm320_vm1, %v3742_v18  ;;  %v1540_v56 = vsel %vm4368_vm4, %v1535_v52, %v1539_v42  ;;  %v1549_v62 = vrot.slane %v1548_v57, 4  ;;  %1698 = vst.msk [vmem:[#allocation2 + $0x8] sm:$0xf] %vm1694_vm5, %v4257_v3  ;;  %1700 = vst.msk [vmem:[#allocation2 + $0x10] sm:$0xf] %vm1694_vm5, %v4257_v3 }
  0x50   : > { %v3744_v59 = vcombine.low %v1526_v38, %v1540_v56  ;;  %v1567_v61 = vrot.slane %v1565_v51, 5  ;;  %v1563_v63 = vrot.slane %v1562_v60, 4  ;;  %1699 = vst.msk [vmem:[#allocation2 + $0xc] sm:$0x1] %vm1696_vm6, %v4257_v3  ;;  %1701 = vst.msk [vmem:[#allocation2 + $0x14] sm:$0x1] %vm1696_vm6, %v4257_v3 }
  0x51   : > { %v1554_v0 = vsel %vm4368_vm4, %v1549_v62, %v1553_v58  ;;  %1704 = vst.msk [vmem:[#allocation2 + $0x20] sm:$0xf] %vm1694_vm5, %v4257_v3  ;;  %1706 = vst.msk [vmem:[#allocation2 + $0x28] sm:$0xf] %vm1694_vm5, %v4257_v3  ;;  %v3759_v6 = vld [vmem:[%s5211_s3 + $0x4] sm:$0xf] }
  0x52   : > { %v1568_v1 = vsel %vm4368_vm4, %v1563_v63, %v1567_v61  ;;  %1705 = vst.msk [vmem:[#allocation2 + $0x24] sm:$0x1] %vm1696_vm6, %v4257_v3  ;;  %1707 = vst.msk [vmem:[#allocation2 + $0x2c] sm:$0x1] %vm1696_vm6, %v4257_v3  ;;  %4189 = vmatprep.subr.msk.bf16.mxu1 %vm333_vm0, %v3759_v6  ;;  %v2039_v7 = vsel %vm333_vm0, %v3759_v6, 0 }
  0x53   : > { %v3745_v2 = vcombine.low %v1554_v0, %v1568_v1  ;;  %1708 = vst.msk [vmem:[#allocation2 + $0x30] sm:$0xf] %vm1694_vm5, %v4257_v3  ;;  %1710 = vst.msk [vmem:[#allocation2 + $0x38] sm:$0xf] %vm1694_vm5, %v4257_v3  ;;  %4078 = vmatpush3.bf16.msra.mxu1 %v2039_v7 }
  0x54   : > { %4064 = vmatmul.mubr.msk.bf16.gmra.mxu1 %vm320_vm1, %v4232_v40  ;;  %1709 = vst.msk [vmem:[#allocation2 + $0x34] sm:$0x1] %vm1696_vm6, %v4257_v3  ;;  %1711 = vst.msk [vmem:[#allocation2 + $0x3c] sm:$0x1] %vm1696_vm6, %v4257_v3  ;;  %4191 = vmatprep.subr.msk.bf16.mxu1 %vm333_vm0, %v4566_v8  ;;  %v4605_v53 = vld [vmem:[#allocation2] sm:$0xf] }
  0x55   : > { %1712 = vst.msk [vmem:[#allocation2 + $0x40] sm:$0xf] %vm1694_vm5, %v4257_v3  ;;  %1714 = vst.msk [vmem:[#allocation2 + $0x48] sm:$0xf] %vm1694_vm5, %v4257_v3  ;;  %v1901_v57 = vshrl.u32 %v4605_v53, 16  ;;  %v1904_v58 = vshll.u32 %v4605_v53, 16 }
  0x56   : > { %4070 = vmatmul.mubr.msk.bf16.vlgmr.msra.gmra.mxu0 %vm320_vm1, %v3743_v27  ;;  %1713 = vst.msk [vmem:[#allocation2 + $0x44] sm:$0x1] %vm1696_vm6, %v4257_v3  ;;  %1715 = vst.msk [vmem:[#allocation2 + $0x4c] sm:$0x1] %vm1696_vm6, %v4257_v3 }
  0x57   : > { %4073 = vmatprep.mubr.msk.bf16.mxu0 %vm320_vm1, %v3744_v59  ;;  %4088 = vmatpush3.bf16.msra.mxu0 %v2139_v5  ;;  %5219 = vst [vmem:[#allocation3_spill] sm:$0xff] %v4605_v53  ;;  %v1903_v3 = vrot.slane %v1901_v57, 4  ;;  %v1906_v4 = vrot.slane %v1904_v58, 5 }
  0x58   : > { %4192 = vmatprep.subr.msk.bf16.mxu0 %vm333_vm0, %v4573_v9 }
  0x5e   : > { %4074 = vmatmul.mubr.msk.bf16.gmra.mxu0 %vm320_vm1, %v3745_v2 }
  0xd3   : > { %v3991_v12 = vpop.f32.mrf.mxu0 }
  0xd4   : > { %v4577_v10 = vpop.f32.mrf.mxu1 }
  0xd5   : > { %v371_v16 = vpop.f32.mrf.mxu0 }
  0xd6   : > { %v4579_v11 = vpop.f32.mrf.mxu1 }
  0xd7   : > { %v3992_v19 = vpop.f32.mrf.mxu0 }
  0xd8   : > { %v4581_v13 = vpop.f32.mrf.mxu1 }
  0xd9   : > { %v374_v22 = vpop.f32.mrf.mxu0 }
  0xda   : > { %v4583_v15 = vpop.f32.mrf.mxu1 }
  0xdc   : > { %v4001_v17 = vpop.f32.mrf.mxu1 }
  0xdd   : > { %v480_v52 = vadd.f32 %v4001_v17, %v3991_v12 }
  0xde   : > { %v471_v18 = vpop.f32.mrf.mxu1 }
  0xdf   : > { %v472_v55 = vadd.f32 %v471_v18, %v371_v16  ;;  %v1892_v16 = vld [vmem:[#allocation2 + $0x4] sm:$0x1] }
  0xe0   : > { %v4002_v20 = vpop.f32.mrf.mxu1 }
  0xe1   : > { %v483_v60 = vadd.f32 %v4002_v20, %v3992_v19  ;;  %v1910_v19 = vshll.u32 %v1892_v16, 16 }
  0xe2   : > { %v474_v21 = vpop.f32.mrf.mxu1 }
  0xe3   : > { %v475_v0 = vadd.f32 %v474_v21, %v374_v22  ;;  %v1907_v21 = vor.u32 %v1906_v4, %v1903_v3  ;;  %v4626_v57 = vrot.slane %v1910_v19, 5  ;;  %v4666_v19 = vsel %vm333_vm0, %v4566_v8, 0 }
  0xe4   : > { %v4005_v23 = vpop.f32.mrf.mxu1  ;;  %v4011_v24 = vpop.f32.mrf.mxu0 }
  0xe5   : > { %v729_v59 = vadd.f32 %v4011_v24, %v480_v52  ;;  %v496_v20 = vadd.f32 %v4005_v23, %v4577_v10  ;;  %v2206_v10 = vld [vmem:[#allocation2] sm:$0xe] }
  0xe6   : > { %v487_v25 = vpop.f32.mrf.mxu1  ;;  %v696_v26 = vpop.f32.mrf.mxu0  ;;  %v3776_v58 = vrot.slane %v2206_v10, 9 }
  0xe7   : > { %v727_v63 = vadd.f32 %v696_v26, %v472_v55 }
  0xe8   : > { %v4006_v28 = vpop.f32.mrf.mxu1  ;;  %v4012_v29 = vpop.f32.mrf.mxu0 }
  0xe9   : > { %v730_v5 = vadd.f32 %v4012_v29, %v483_v60  ;;  %v488_v29 = vadd.f32 %v487_v25, %v4579_v11 }
  0xea   : > { %v4585_v30 = vpop.f32.mrf.mxu1  ;;  %v699_v31 = vpop.f32.mrf.mxu0 }
  0xeb   : > { %v728_v17 = vadd.f32 %v699_v31, %v475_v0 }
  0xec   : > { %v4021_v32 = vpop.f32.mrf.mxu1 }
  0xed   : > { %v848_v1 = vadd.f32 %v4021_v32, %v729_v59 }
  0xee   : > { %v815_v33 = vpop.f32.mrf.mxu1  ;;  %v4015_v34 = vpop.f32.mrf.mxu0 }
  0xef   : > { %v846_v6 = vadd.f32 %v815_v33, %v727_v63  ;;  %v499_v33 = vadd.f32 %v4006_v28, %v4581_v13  ;;  %v733_v23 = vadd.f32 %v4015_v34, %v496_v20  ;;  %v2235_v63 = vrot.slane %v1892_v16, 5 }
  0xf0   : > { %v4022_v35 = vpop.f32.mrf.mxu1  ;;  %v4587_v36 = vpop.f32.mrf.mxu0 }
  0xf2   : > { %v818_v37 = vpop.f32.mrf.mxu1  ;;  %v4589_v39 = vpop.f32.mrf.mxu0 }
  0xf3   : > { %v847_v26 = vadd.f32 %v818_v37, %v728_v17  ;;  %v491_v37 = vadd.f32 %v4585_v30, %v4583_v15 }
  0xf4   : > { %v4591_v27 = vpop.f32.mrf.mxu1  ;;  %v4593_v40 = vpop.f32.mrf.mxu0 }
  0xf5   : > { %v732_v0 = vadd.f32 %v4593_v40, %v491_v37 }
  0xf6   : > { %v4595_v41 = vpop.f32.mrf.mxu1  ;;  %v4031_v42 = vpop.f32.mrf.mxu0 }
  0xf7   : > { %v967_v18 = vadd.f32 %v4031_v42, %v848_v1 }
  0xf8   : > { %v4597_v44 = vpop.f32.mrf.mxu1  ;;  %v934_v14 = vpop.f32.mrf.mxu0 }
  0xf9   : > { %v965_v22 = vadd.f32 %v934_v14, %v846_v6  ;;  %v3006_v6 = vld [vmem:[#allocation2 + $0x48] sm:$0xf] }
  0xfa   : > { %v4032_v45 = vpop.f32.mrf.mxu0  ;;  %v4599_v46 = vpop.f32.mrf.mxu1  ;;  %v3110_v37 = vshll.u32 %v3006_v6, 16 }
  0xfc   : > { %v937_v47 = vpop.f32.mrf.mxu0  ;;  %v4041_v49 = vpop.f32.mrf.mxu1 }
  0xfd   : > { %v1197_v32 = vadd.f32 %v4041_v49, %v967_v18  ;;  %v4632_v49 = vrot.slane %v1907_v21, 4  ;;  %v966_v11 = vadd.f32 %v937_v47, %v847_v26  ;;  %v4671_v26 = vsel %vm333_vm0, %v4573_v9, 0 }
  0xfe   : > { %v4601_v48 = vpop.f32.mrf.mxu0  ;;  %v1164_v51 = vpop.f32.mrf.mxu1 }
  0xff   : > { %v1913_v40 = vsel %vm4368_vm4, %v4632_v49, %v4626_v57 }
 0x100   : > { %v4603_v50 = vpop.f32.mrf.mxu0  ;;  %v4042_v38 = vpop.f32.mrf.mxu1 }
 0x102   : > { %v4607_v54 = vpop.f32.mrf.mxu0  ;;  %v1167_v61 = vpop.f32.mrf.mxu1 }
 0x103   : > { %v1196_v15 = vadd.f32 %v1167_v61, %v966_v11  ;;  %v4645_v61 = vld [vmem:[%s5210_s2] ss:$0 sm:$0xff] }
 0x104   : > { %v4609_v56 = vpop.f32.mrf.mxu0  ;;  %v4613_v7 = vpop.f32.mrf.mxu1 }
 0x105   : > { %5220 = vst [vmem:[#allocation4_spill] sm:$0xff] %v4609_v56  ;;  %v849_v56 = vadd.f32 %v4022_v35, %v730_v5  ;;  %v1195_v35 = vadd.f32 %v1164_v51, %v965_v22  ;;  %v734_v51 = vadd.f32 %v4589_v39, %v499_v33  ;;  %v4659_v5 = vsel %vm4653_vm10, %v3776_v58, %v2235_v63 }
 0x106   : > { %v4051_v62 = vpop.f32.mrf.mxu0  ;;  %v4615_v53 = vpop.f32.mrf.mxu1 }
 0x107   : > { %v968_v31 = vadd.f32 %v4032_v45, %v849_v56  ;;  %v1316_v13 = vadd.f32 %v4051_v62, %v1197_v32  ;;  %v731_v45 = vadd.f32 %v4587_v36, %v488_v29  ;;  %v852_v56 = vadd.f32 %v4591_v27, %v733_v23 }
 0x108   : > { %v1283_v2 = vpop.f32.mrf.mxu0  ;;  %v4618_v52 = vpop.f32.mrf.mxu1  ;;  %v851_v27 = vadd.f32 %v4599_v46, %v732_v0 }
 0x109   : > { %v1198_v25 = vadd.f32 %v4042_v38, %v968_v31  ;;  %v1314_v59 = vadd.f32 %v1283_v2, %v1195_v35  ;;  %v850_v47 = vadd.f32 %v4595_v41, %v731_v45  ;;  %v853_v38 = vadd.f32 %v4597_v44, %v734_v51 }
 0x10a   : > { %v4052_v12 = vpop.f32.mrf.mxu0  ;;  %v4624_v42 = vpop.f32.mrf.mxu1  ;;  %v971_v39 = vadd.f32 %v4601_v48, %v852_v56  ;;  %v3107_v31 = vshrl.u32 %v3006_v6, 16 }
 0x10b   : > { %v1317_v1 = vadd.f32 %v4052_v12, %v1198_v25  ;;  %v969_v12 = vadd.f32 %v4603_v50, %v850_v47  ;;  %v972_v16 = vadd.f32 %v4607_v54, %v853_v38  ;;  %v4676_v50 = vld [vmem:[%s5211_s3 + $0x10] sm:$0xf]  ;;  %v4681_v54 = vld [vmem:[%s5211_s3 + $0x14] sm:$0xf]  ;;  %v4701_v47 = vrot.slane %v3110_v37, 5 }
 0x10c   : > { %v1286_v24 = vpop.f32.mrf.mxu0  ;;  %v4061_v28 = vpop.f32.mrf.mxu1  ;;  %v1201_v17 = vadd.f32 %v4613_v7, %v971_v39  ;;  %v5223_v8 = vld [vmem:[#allocation4_spill] sm:$0xff] }
 0x10d   : > { %v1435_v30 = vadd.f32 %v4061_v28, %v1316_v13  ;;  %v1315_v44 = vadd.f32 %v1286_v24, %v1196_v15  ;;  %v970_v7 = vadd.f32 %v5223_v8, %v851_v27  ;;  %v1199_v32 = vadd.f32 %v4615_v53, %v969_v12  ;;  %v1838_v8 = vld [vmem:[#allocation2 + $0xc] sm:$0x1] }
 0x10e   : > { %v4622_v55 = vpop.f32.mrf.mxu0  ;;  %v1402_v60 = vpop.f32.mrf.mxu1  ;;  %v1202_v29 = vadd.f32 %v4618_v52, %v972_v16  ;;  %v4691_v28 = vsel %vm333_vm0, %v4676_v50, 0  ;;  %v4695_v53 = vsel %vm333_vm0, %v4681_v54, 0 }
 0x10f   : > { %v1433_v36 = vadd.f32 %v1402_v60, %v1314_v59  ;;  %v1320_v11 = vadd.f32 %v4622_v55, %v1201_v17  ;;  %v1200_v13 = vadd.f32 %v4624_v42, %v970_v7  ;;  %v4699_v42 = vrot.slane %v3107_v31, 4 }
 0x110   : > { %v4630_v14 = vpop.f32.mrf.mxu0  ;;  %v4062_v3 = vpop.f32.mrf.mxu1 }
 0x111   : > { %v1436_v48 = vadd.f32 %v4062_v3, %v1317_v1  ;;  %v1318_v59 = vadd.f32 %v4630_v14, %v1199_v32 }
 0x112   : > { %v4056_v34 = vpop.f32.mrf.mxu0  ;;  %v1405_v2 = vpop.f32.mrf.mxu1 }
 0x113   : > { %v1434_v21 = vadd.f32 %v1405_v2, %v1315_v44  ;;  %v1321_v55 = vadd.f32 %v4056_v34, %v1202_v29 }
 0x114   : > { %v1302_v62 = vpop.f32.mrf.mxu0  ;;  %v4065_v22 = vpop.f32.mrf.mxu1 }
 0x115   : > { %v1439_v15 = vadd.f32 %v4065_v22, %v1320_v11  ;;  %v1319_v38 = vadd.f32 %v1302_v62, %v1200_v13  ;;  %v1847_v62 = vld [vmem:[#allocation2 + $0x18] sm:$0xf]  ;;  %v1832_v22 = vld [vmem:[#allocation2 + $0x8] sm:$0xf] }
 0x116   : > { %v4071_v4 = vpop.f32.mrf.mxu0  ;;  %v1418_v23 = vpop.f32.mrf.mxu1 }
 0x117   : > { %v1665_v46 = vadd.f32 %v4071_v4, %v1435_v30  ;;  %v1437_v3 = vadd.f32 %v1418_v23, %v1318_v59  ;;  %v1856_v59 = vld [vmem:[#allocation2 + $0x24] sm:$0x1] }
 0x118   : > { %v1632_v18 = vpop.f32.mrf.mxu0  ;;  %v4066_v58 = vpop.f32.mrf.mxu1 }
 0x119   : > { %v1680_v20 = vadd.f32 %v4645_v61, %v1665_v46  ;;  %v1663_v24 = vadd.f32 %v1632_v18, %v1433_v36  ;;  %v1440_v39 = vadd.f32 %v4066_v58, %v1321_v55  ;;  %v1853_v58 = vld [vmem:[#allocation2 + $0x20] sm:$0xf] }
 0x11a   : > { %v4072_v33 = vpop.f32.mrf.mxu0  ;;  %v1421_v0 = vpop.f32.mrf.mxu1 }
 0x11b   : > { %v1688_v9 = vmax.f32 %v1680_v20, 0.0  ;;  %v1678_v35 = vadd.f32 %v4645_v61, %v1663_v24  ;;  %v1666_v10 = vadd.f32 %v4072_v33, %v1436_v48  ;;  %v1850_v48 = vld [vmem:[#allocation2 + $0x1c] sm:$0x1]  ;;  %v1438_v17 = vadd.f32 %v1421_v0, %v1319_v38 }
 0x11c   : > { %v1635_v25 = vpop.f32.mrf.mxu0  ;;  %v4734_v38 = vld [vmem:[%s5211_s3 + $0x1c] sm:$0xf] }
 0x11d   : > { %v3886_v52 = vpack.c.bf16 %v1688_v9, %v1688_v9  ;;  %v1686_v45 = vmax.f32 %v1678_v35, 0.0  ;;  %v1681_v51 = vadd.f32 %v4645_v61, %v1666_v10  ;;  %v1664_v56 = vadd.f32 %v1635_v25, %v1434_v21 }
 0x11e   : > { %v4075_v36 = vpop.f32.mrf.mxu0 }
 0x11f   : > { %v1765_v30 = vshrl.u32 %v3886_v52, 16  ;;  %v3884_v60 = vpack.c.bf16 %v1686_v45, %v1686_v45  ;;  %v1689_v63 = vmax.f32 %v1681_v51, 0.0  ;;  %v1679_v1 = vadd.f32 %v4645_v61, %v1664_v56  ;;  %v4724_v45 = vld [vmem:[%s5211_s3 + $0x18] sm:$0xf] }
 0x120   : > { %v1768_v4 = vshll.u32 %v3886_v52, 16  ;;  %v1669_v12 = vadd.f32 %v4075_v36, %v1439_v15  ;;  %v1648_v16 = vpop.f32.mrf.mxu0  ;;  %v1844_v36 = vld [vmem:[#allocation2 + $0x14] sm:$0x1] }
 0x121   : > { %v1767_v27 = vrot.slane %v1765_v30, 7  ;;  %v1749_v34 = vshrl.u32 %v3884_v60, 16  ;;  %v3887_v44 = vpack.c.bf16 %v1689_v63, %v1689_v63  ;;  %v1752_v2 = vshll.u32 %v3884_v60, 16 }
 0x122   : > { %v1687_v6 = vmax.f32 %v1679_v1, 0.0  ;;  %v1684_v29 = vadd.f32 %v4645_v61, %v1669_v12  ;;  %v1667_v33 = vadd.f32 %v1648_v16, %v1437_v3  ;;  %v4076_v31 = vpop.f32.mrf.mxu0  ;;  %v1841_v1 = vld [vmem:[#allocation2 + $0x10] sm:$0xf]  ;;  %v4747_v16 = vsel %vm333_vm0, %v4734_v38, 0 }
 0x123   : > { %v1770_v18 = vor.u32 %v1768_v4, %v1767_v27  ;;  %v1771_v20 = vrot.slane %v1767_v27, 4  ;;  %v1751_v24 = vrot.slane %v1749_v34, 7  ;;  %v1773_v21 = vshrl.u32 %v3887_v44, 16 }
 0x124   : > { %v1776_v7 = vshll.u32 %v3887_v44, 16  ;;  %v3885_v32 = vpack.c.bf16 %v1687_v6, %v1687_v6  ;;  %v1692_v25 = vmax.f32 %v1684_v29, 0.0  ;;  %v1651_v52 = vpop.f32.mrf.mxu0  ;;  %v1682_v55 = vadd.f32 %v4645_v61, %v1667_v33 }
 0x125   : > { %v1848_v9 = vsel %vm4706_vm12, %v1770_v18, %v1847_v62  ;;  %v1851_v35 = vsel %vm4712_vm13, %v1771_v20, %v1850_v48  ;;  %v1754_v10 = vor.u32 %v1752_v2, %v1751_v24  ;;  %v1755_v23 = vrot.slane %v1751_v24, 4  ;;  %v1871_v20 = vld [vmem:[#allocation2 + $0x38] sm:$0xf]  ;;  %v1874_v24 = vld [vmem:[#allocation2 + $0x3c] sm:$0x1] }
 0x126   : > { %1849 = vst [vmem:[#allocation2 + $0x18] sm:$0xf] %v1848_v9  ;;  %1852 = vst [vmem:[#allocation2 + $0x1c] sm:$0x1] %v1851_v35  ;;  %v1775_v37 = vrot.slane %v1773_v21, 7  ;;  %v1757_v11 = vshrl.u32 %v3885_v32, 16  ;;  %v1670_v15 = vadd.f32 %v4076_v31, %v1440_v39  ;;  %v3890_v0 = vpack.c.bf16 %v1692_v25, %v1692_v25 }
 0x127   : > { %v1760_v13 = vshll.u32 %v3885_v32, 16  ;;  %v1833_v51 = vsel %vm4706_vm12, %v1754_v10, %v1832_v22  ;;  %v1839_v56 = vsel %vm4712_vm13, %v1755_v23, %v1838_v8  ;;  %v1690_v3 = vmax.f32 %v1682_v55, 0.0  ;;  %v1859_v9 = vld [vmem:[#allocation2 + $0x28] sm:$0xf] }
 0x128   : > { %1834 = vst [vmem:[#allocation2 + $0x8] sm:$0xf] %v1833_v51  ;;  %1840 = vst [vmem:[#allocation2 + $0xc] sm:$0x1] %v1839_v56  ;;  %v1778_v30 = vor.u32 %v1776_v7, %v1775_v37  ;;  %v1779_v60 = vrot.slane %v1775_v37, 4  ;;  %v1759_v63 = vrot.slane %v1757_v11, 7  ;;  %v1685_v27 = vadd.f32 %v4645_v61, %v1670_v15 }
 0x129   : > { %v1668_v4 = vadd.f32 %v1651_v52, %v1438_v17  ;;  %v4739_v39 = vsel %vm333_vm0, %v4724_v45, 0  ;;  %v1797_v2 = vshrl.u32 %v3890_v0, 16  ;;  %v3888_v6 = vpack.c.bf16 %v1690_v3, %v1690_v3  ;;  %v1862_v52 = vld [vmem:[#allocation2 + $0x2c] sm:$0x1] }
 0x12a   : > { %v1854_v34 = vsel %vm4706_vm12, %v1778_v30, %v1853_v58  ;;  %v1857_v44 = vsel %vm4712_vm13, %v1779_v60, %v1856_v59  ;;  %v1762_v62 = vor.u32 %v1760_v13, %v1759_v63  ;;  %v1763_v48 = vrot.slane %v1759_v63, 4  ;;  %v1877_v63 = vld [vmem:[#allocation2 + $0x40] sm:$0xf] }
 0x12b   : > { %1855 = vst [vmem:[#allocation2 + $0x20] sm:$0xf] %v1854_v34  ;;  %1858 = vst [vmem:[#allocation2 + $0x24] sm:$0x1] %v1857_v44  ;;  %v1693_v12 = vmax.f32 %v1685_v27, 0.0  ;;  %v1683_v21 = vadd.f32 %v4645_v61, %v1668_v4  ;;  %v3113_v22 = vor.u32 %v4701_v47, %v4699_v42  ;;  %v1799_v8 = vrot.slane %v1797_v2, 7 }
 0x12c   : > { %v1842_v17 = vsel %vm4706_vm12, %v1762_v62, %v1841_v1  ;;  %v1845_v18 = vsel %vm4712_vm13, %v1763_v48, %v1844_v36  ;;  %v1800_v7 = vshll.u32 %v3890_v0, 16  ;;  %v1781_v32 = vshrl.u32 %v3888_v6, 16  ;;  %v1880_v1 = vld [vmem:[#allocation2 + $0x44] sm:$0x1]  ;;  %v1865_v44 = vld [vmem:[#allocation2 + $0x30] sm:$0xf] }
 0x12d   : > { %1843 = vst [vmem:[#allocation2 + $0x10] sm:$0xf] %v1842_v17  ;;  %1846 = vst [vmem:[#allocation2 + $0x14] sm:$0x1] %v1845_v18  ;;  %v3891_v29 = vpack.c.bf16 %v1693_v12, %v1693_v12  ;;  %v1886_v33 = vld [vmem:[#allocation2 + $0x18] sm:$0xf] }
 0x12e   : > { %v1784_v31 = vshll.u32 %v3888_v6, 16  ;;  %v1691_v35 = vmax.f32 %v1683_v21, 0.0  ;;  %v1943_v10 = vshrl.u32 %v1886_v33, 16  ;;  %v1946_v23 = vshll.u32 %v1886_v33, 16  ;;  %v1868_v62 = vld [vmem:[#allocation2 + $0x34] sm:$0x1] }
 0x12f   : > { %v1802_v37 = vor.u32 %v1800_v7, %v1799_v8  ;;  %v1803_v11 = vrot.slane %v1799_v8, 4  ;;  %v1783_v13 = vrot.slane %v1781_v32, 7  ;;  %v1805_v25 = vshrl.u32 %v3891_v29, 16  ;;  %v1884_v61 = vld [vmem:[#allocation2 + $0x8] sm:$0xf]  ;;  %v5228_v2 = vld [vmem:[#allocation3_spill] sm:$0xff] }
 0x130   : > { %v1808_v51 = vshll.u32 %v3891_v29, 16  ;;  %v3889_v56 = vpack.c.bf16 %v1691_v35, %v1691_v35  ;;  %v1915_v58 = vshrl.u32 %v1884_v61, 16  ;;  %v1918_v59 = vshll.u32 %v1884_v61, 16 }
 0x131   : > { %v1872_v55 = vsel %vm4706_vm12, %v1802_v37, %v1871_v20  ;;  %v1875_v15 = vsel %vm4712_vm13, %v1803_v11, %v1874_v24  ;;  %v1786_v30 = vor.u32 %v1784_v31, %v1783_v13  ;;  %v1787_v60 = vrot.slane %v1783_v13, 4  ;;  %v4768_v31 = vld [vmem:[#allocation2 + $0xc] sm:$0x1] }
 0x132   : > { %1873 = vst [vmem:[#allocation2 + $0x38] sm:$0xf] %v1872_v55  ;;  %1876 = vst [vmem:[#allocation2 + $0x3c] sm:$0x1] %v1875_v15  ;;  %v1807_v0 = vrot.slane %v1805_v25, 7  ;;  %v1789_v36 = vshrl.u32 %v3889_v56, 16  ;;  %v3768_v6 = vcombine.low %v5228_v2, %v1884_v61 }
 0x133   : > { %v1792_v3 = vshll.u32 %v3889_v56, 16  ;;  %v1917_v27 = vrot.slane %v1915_v58, 4  ;;  %v1860_v4 = vsel %vm4706_vm12, %v1786_v30, %v1859_v9  ;;  %v1863_v34 = vsel %vm4712_vm13, %v1787_v60, %v1862_v52  ;;  %v4765_v12 = vld [vmem:[#allocation2 + $0x20] sm:$0xf]  ;;  %v4784_v58 = vld [vmem:[#allocation2 + $0x1c] sm:$0x1] }
 0x134   : > { %v1920_v48 = vrot.slane %v1918_v59, 5  ;;  %1861 = vst [vmem:[#allocation2 + $0x28] sm:$0xf] %v1860_v4  ;;  %1864 = vst [vmem:[#allocation2 + $0x2c] sm:$0x1] %v1863_v34  ;;  %v1810_v17 = vor.u32 %v1808_v51, %v1807_v0  ;;  %v1811_v18 = vrot.slane %v1807_v0, 4  ;;  %4089 = vmatprep.mubr.msk.bf16.mxu0 %vm320_vm1, %v3768_v6 }
 0x135   : > { %v1791_v20 = vrot.slane %v1789_v36, 7  ;;  %v1885_v24 = vld [vmem:[#allocation2 + $0x10] sm:$0xf]  ;;  %v1945_v21 = vrot.slane %v1943_v10, 4  ;;  %v1948_v32 = vrot.slane %v1946_v23, 5  ;;  %v1960_v23 = vshll.u32 %v4765_v12, 16 }
 0x136   : > { %v1929_v8 = vshrl.u32 %v1885_v24, 16  ;;  %v1932_v7 = vshll.u32 %v1885_v24, 16  ;;  %v3769_v29 = vcombine.low %v1885_v24, %v1886_v33  ;;  %v1878_v9 = vsel %vm4706_vm12, %v1810_v17, %v1877_v63  ;;  %v4774_v13 = vld [vmem:[#allocation2 + $0x14] sm:$0x1]  ;;  %v4793_v34 = vld [vmem:[#allocation2 + $0x8] sm:$0xe] }
 0x137   : > { %v1881_v35 = vsel %vm4712_vm13, %v1811_v18, %v1880_v1  ;;  %v1794_v37 = vor.u32 %v1792_v3, %v1791_v20  ;;  %v1795_v11 = vrot.slane %v1791_v20, 4  ;;  %1879 = vst [vmem:[#allocation2 + $0x40] sm:$0xf] %v1878_v9  ;;  %v1957_v33 = vshrl.u32 %v4765_v12, 16  ;;  %v4790_v1 = vld [vmem:[#allocation2 + $0x24] sm:$0x1] }
 0x138   : > { %1882 = vst [vmem:[#allocation2 + $0x44] sm:$0x1] %v1881_v35  ;;  %v1931_v10 = vrot.slane %v1929_v8, 4  ;;  %v1934_v25 = vrot.slane %v1932_v7, 5  ;;  %4090 = vmatmul.mubr.msk.bf16.vlgmr.msra.gmra.mxu0 %vm320_vm1, %v3769_v29  ;;  %v1921_v51 = vor.u32 %v1920_v48, %v1917_v27  ;;  %v1924_v56 = vshll.u32 %v4768_v31, 16 }
 0x139   : > { %v1866_v61 = vsel %vm4706_vm12, %v1794_v37, %v1865_v44  ;;  %v1869_v52 = vsel %vm4712_vm13, %v1795_v11, %v1868_v62  ;;  %4108 = vmatpush3.bf16.msra.mxu0 %v4671_v26  ;;  %v1959_v59 = vrot.slane %v1957_v33, 4  ;;  %v1962_v55 = vrot.slane %v1960_v23, 5  ;;  %v1890_v15 = vld [vmem:[#allocation2 + $0x38] sm:$0xf]  ;;  %v4807_v24 = vld [vmem:[#allocation2 + $0x3c] sm:$0x1] }
 0x13a   : > { %1867 = vst [vmem:[#allocation2 + $0x30] sm:$0xf] %v1866_v61  ;;  %1870 = vst [vmem:[#allocation2 + $0x34] sm:$0x1] %v1869_v52  ;;  %v1935_v30 = vor.u32 %v1934_v25, %v1931_v10  ;;  %v1938_v60 = vshll.u32 %v4774_v13, 16  ;;  %4194 = vmatprep.subr.msk.bf16.mxu0 %vm333_vm0, %v4681_v54  ;;  %v1922_v14 = vrot.slane %v1921_v51, 4  ;;  %v1949_v27 = vor.u32 %v1948_v32, %v1945_v21 }
 0x13b   : > { %v1926_v46 = vrot.slane %v1924_v56, 5  ;;  %v1999_v63 = vshrl.u32 %v1890_v15, 16  ;;  %v2002_v0 = vshll.u32 %v1890_v15, 16  ;;  %v1888_v36 = vld [vmem:[#allocation2 + $0x28] sm:$0xf]  ;;  %v1952_v4 = vshll.u32 %v4784_v58, 16 }
 0x13c   : > { %v1936_v3 = vrot.slane %v1935_v30, 4  ;;  %v1940_v26 = vrot.slane %v1938_v60, 5  ;;  %v1971_v44 = vshrl.u32 %v1888_v36, 16  ;;  %v1974_v62 = vshll.u32 %v1888_v36, 16  ;;  %v4798_v2 = vld [vmem:[#allocation2 + $0x2c] sm:$0x1] }
 0x13d   : > { %v3770_v48 = vcombine.low %v4765_v12, %v1888_v36  ;;  %v1927_v54 = vsel %vm4368_vm4, %v1922_v14, %v1926_v46  ;;  %v2001_v17 = vrot.slane %v1999_v63, 4  ;;  %v2004_v18 = vrot.slane %v2002_v0, 5  ;;  %v4237_v35 = vld [vmem:[#allocation2 + $0x8] ss:$8 sps:$4 sm:$0xff]   ;;  %v4819_v56 = vld [vmem:[#allocation2 + $0x4c] sm:$0x1] }
 0x13e   : > { %v3760_v6 = vcombine.low %v1913_v40, %v1927_v54  ;;  %v1941_v20 = vsel %vm4368_vm4, %v1936_v3, %v1940_v26  ;;  %v1973_v21 = vrot.slane %v1971_v44, 4  ;;  %v1976_v12 = vrot.slane %v1974_v62, 5  ;;  %v2208_v51 = vld [vmem:[#allocation2 + $0x10] sm:$0xe]  ;;  %v2209_v14 = vld [vmem:[#allocation2 + $0x18] sm:$0xe] }
 0x13f   : > { %4093 = vmatprep.mubr.msk.bf16.mxu0 %vm320_vm1, %v3770_v48  ;;  %v1950_v8 = vrot.slane %v1949_v27, 4  ;;  %v1954_v7 = vrot.slane %v1952_v4, 5  ;;  %v1963_v32 = vor.u32 %v1962_v55, %v1959_v59  ;;  %v1966_v29 = vshll.u32 %v4790_v1, 16  ;;  %v4824_v3 = vld [vmem:[#allocation2 + $0xc] sm:$0x1] }
 0x140   : > { %4079 = vmatprep.mubr.msk.bf16.mxu1 %vm320_vm1, %v3760_v6  ;;  %v1980_v57 = vshll.u32 %v4798_v2, 16  ;;  %v2005_v49 = vor.u32 %v2004_v18, %v2001_v17  ;;  %v1977_v37 = vor.u32 %v1976_v12, %v1973_v21  ;;  %v2008_v10 = vshll.u32 %v4807_v24, 16  ;;  %v4833_v4 = vld [vmem:[#allocation2 + $0x14] sm:$0x1]  ;;  %v2716_v6 = vld [vmem:[#allocation2 + $0x10] sm:$0xe] }
 0x141   : > { %v1889_v40 = vld [vmem:[#allocation2 + $0x30] sm:$0xf]  ;;  %v1955_v9 = vsel %vm4368_vm4, %v1950_v8, %v1954_v7  ;;  %v4815_v11 = vld [vmem:[#allocation2 + $0x34] sm:$0x1]  ;;  %v3777_v25 = vrot.slane %v4793_v34, 9  ;;  %v1964_v59 = vrot.slane %v1963_v32, 4 }
 0x142   : > { %v1985_v33 = vshrl.u32 %v1889_v40, 16  ;;  %v1988_v23 = vshll.u32 %v1889_v40, 16  ;;  %v3771_v61 = vcombine.low %v1889_v40, %v1890_v15  ;;  %v3761_v52 = vcombine.low %v1941_v20, %v1955_v9  ;;  %v2715_v34 = vld [vmem:[#allocation2 + $0x8] sm:$0xe]  ;;  %v2210_v17 = vld [vmem:[#allocation2 + $0x20] sm:$0xe] }
 0x143   : > { %v1968_v55 = vrot.slane %v1966_v29, 5  ;;  %v1978_v30 = vrot.slane %v1977_v37, 4  ;;  %v1982_v60 = vrot.slane %v1980_v57, 5  ;;  %v1994_v0 = vshll.u32 %v4815_v11, 16  ;;  %v2211_v12 = vld [vmem:[#allocation2 + $0x28] sm:$0xe] }
 0x144   : > { %v1987_v46 = vrot.slane %v1985_v33, 4  ;;  %v1990_v63 = vrot.slane %v1988_v23, 5  ;;  %4094 = vmatmul.mubr.msk.bf16.gmra.mxu0 %vm320_vm1, %v3771_v61  ;;  %4080 = vmatmul.mubr.msk.bf16.vlgmr.msra.gmra.mxu1 %vm320_vm1, %v3761_v52  ;;  %v2006_v36 = vrot.slane %v2005_v49, 4  ;;  %v2239_v27 = vrot.slane %v4768_v31, 5  ;;  %v4238_v8 = vld [vmem:[#allocation2 + $0x18] ss:$8 sps:$4 sm:$0xff]  }
 0x145   : > { %4098 = vmatpush3.bf16.msra.mxu1 %v4666_v19  ;;  %4109 = vmatprep.mubr.msk.bf16.mxu0 %vm320_vm1, %v4237_v35  ;;  %v1969_v15 = vsel %vm4368_vm4, %v1964_v59, %v1968_v55  ;;  %v1983_v26 = vsel %vm4368_vm4, %v1978_v30, %v1982_v60  ;;  %v3116_v44 = vshll.u32 %v4819_v56, 16  ;;  %v2010_v54 = vrot.slane %v2008_v10, 5  ;;  %v4845_v57 = vld [vmem:[#allocation2 + $0x1c] sm:$0x1]  ;;  %v4847_v49 = vld [vmem:[#allocation2 + $0x24] sm:$0x1] }
 0x146   : > { %v3762_v62 = vcombine.low %v1969_v15, %v1983_v26  ;;  %v1991_v48 = vor.u32 %v1990_v63, %v1987_v46  ;;  %4193 = vmatprep.subr.msk.bf16.mxu1 %vm333_vm0, %v4676_v50  ;;  %v3778_v19 = vrot.slane %v2208_v51, 9  ;;  %v1996_v18 = vrot.slane %v1994_v0, 5  ;;  %v4239_v40 = vld [vmem:[#allocation2 + $0x28] ss:$8 sps:$4 sm:$0xff]   ;;  %v2717_v10 = vld [vmem:[#allocation2 + $0x18] sm:$0xe] }
 0x147   : > { %v2240_v20 = vsel %vm4653_vm10, %v3777_v25, %v2239_v27  ;;  %v2243_v31 = vrot.slane %v4774_v13, 5  ;;  %v3779_v21 = vrot.slane %v2209_v14, 9  ;;  %v2011_v32 = vsel %vm4368_vm4, %v2006_v36, %v2010_v54  ;;  %v2718_v61 = vld [vmem:[#allocation2 + $0x20] sm:$0xe]  ;;  %v2212_v52 = vld [vmem:[#allocation2 + $0x30] sm:$0xe] }
 0x148   : > { %4083 = vmatprep.mubr.msk.bf16.mxu1 %vm320_vm1, %v3762_v62  ;;  %v1992_v7 = vrot.slane %v1991_v48, 4  ;;  %v2247_v50 = vrot.slane %v4784_v58, 5  ;;  %v3811_v29 = vrot.slane %v2715_v34, 9  ;;  %v2741_v9 = vrot.slane %v4824_v3, 5  ;;  %v2213_v60 = vld [vmem:[#allocation2 + $0x38] sm:$0xe] }
 0x149   : > { %v4851_v13 = vsel %vm4653_vm10, %v3778_v19, %v2243_v31  ;;  %v3812_v35 = vrot.slane %v2716_v6, 9  ;;  %v2745_v37 = vrot.slane %v4833_v4, 5  ;;  %v3785_v58 = vcombine.low %v4659_v5, %v2240_v20  ;;  %v4867_v14 = vld [vmem:[#allocation2 + $0x2c] sm:$0x1]  ;;  %v4873_v36 = vld [vmem:[#allocation2 + $0x34] sm:$0x1] }
 0x14a   : > { %v1997_v25 = vsel %vm4368_vm4, %v1992_v7, %v1996_v18  ;;  %v4860_v33 = vsel %vm4653_vm10, %v3779_v21, %v2247_v50  ;;  %v3780_v23 = vrot.slane %v2210_v17, 9  ;;  %v2742_v59 = vsel %vm4653_vm10, %v3811_v29, %v2741_v9  ;;  %v2719_v15 = vld [vmem:[#allocation2 + $0x28] sm:$0xe]  ;;  %v2720_v62 = vld [vmem:[#allocation2 + $0x30] sm:$0xe] }
 0x14b   : > { %v3763_v51 = vcombine.low %v1997_v25, %v2011_v32  ;;  %v2746_v55 = vsel %vm4653_vm10, %v3812_v35, %v2745_v37  ;;  %v2251_v30 = vrot.slane %v4790_v1, 5  ;;  %v3786_v5 = vcombine.low %v4851_v13, %v4860_v33  ;;  %v2485_v6 = vld [vmem:[#allocation2 + $0x8] sm:$0xf]  ;;  %v2487_v7 = vld [vmem:[#allocation2 + $0x10] sm:$0xf] }
 0x14c   : > { %4110 = vmatmul.mubr.msk.bf16.vlgmr.msra.gmra.mxu0 %vm320_vm1, %v4238_v8  ;;  %v3820_v46 = vcombine.low %v2742_v59, %v2746_v55  ;;  %v3781_v63 = vrot.slane %v2211_v12, 9  ;;  %v2255_v0 = vrot.slane %v4798_v2, 5  ;;  %v3813_v1 = vrot.slane %v2717_v10, 9  ;;  %v4916_v37 = vld [vmem:[#allocation2 + $0x44] sm:$0x1] }
 0x14d   : > { %4084 = vmatmul.mubr.msk.bf16.gmra.mxu1 %vm320_vm1, %v3763_v51  ;;  %4113 = vmatprep.mubr.msk.bf16.mxu0 %vm320_vm1, %v4239_v40  ;;  %v2749_v26 = vrot.slane %v4845_v57, 5  ;;  %v3814_v27 = vrot.slane %v2718_v61, 9  ;;  %v2753_v34 = vrot.slane %v4847_v49, 5  ;;  %v3782_v2 = vrot.slane %v2212_v52, 9  ;;  %v4905_v40 = vld [vmem:[#allocation2 + $0x3c] sm:$0x1] }
 0x14e   : > { %4099 = vmatprep.mubr.msk.bf16.mxu1 %vm320_vm1, %v3785_v58  ;;  %v2256_v48 = vsel %vm4653_vm10, %v3781_v63, %v2255_v0  ;;  %4128 = vmatpush3.bf16.msra.mxu0 %v4695_v53  ;;  %v2259_v54 = vrot.slane %v4815_v11, 5  ;;  %v3783_v19 = vrot.slane %v2213_v60, 9  ;;  %v2252_v17 = vsel %vm4653_vm10, %v3780_v23, %v2251_v30  ;;  %v4240_v53 = vld [vmem:[#allocation2 + $0x38] ss:$8 sps:$4 sm:$0xff]  }
 0x14f   : > { %v4888_v18 = vsel %vm4653_vm10, %v3813_v1, %v2749_v26  ;;  %v4892_v20 = vsel %vm4653_vm10, %v3814_v27, %v2753_v34  ;;  %v2263_v31 = vrot.slane %v4807_v24, 5  ;;  %4196 = vmatprep.subr.msk.bf16.mxu0 %vm333_vm0, %v4734_v38  ;;  %v3787_v11 = vcombine.low %v2252_v17, %v2256_v48  ;;  %v2721_v10 = vld [vmem:[#allocation2 + $0x38] sm:$0xe]  ;;  %v2722_v61 = vld [vmem:[#allocation2 + $0x40] sm:$0xe] }
 0x150   : > { %v3821_v21 = vcombine.low %v4888_v18, %v4892_v20  ;;  %v3815_v12 = vrot.slane %v2719_v15, 9  ;;  %v2757_v8 = vrot.slane %v4867_v14, 5  ;;  %v4902_v32 = vsel %vm4653_vm10, %v3782_v2, %v2259_v54  ;;  %v2489_v55 = vld [vmem:[#allocation2 + $0x18] sm:$0xf]  ;;  %v2491_v15 = vld [vmem:[#allocation2 + $0x20] sm:$0xf] }
 0x151   : > { %v3816_v50 = vrot.slane %v2720_v62, 9  ;;  %v2761_v29 = vrot.slane %v4873_v36, 5  ;;  %v2502_v24 = vshrl.u32 %v2485_v6, 16  ;;  %v4909_v38 = vsel %vm4653_vm10, %v3783_v19, %v2263_v31  ;;  %v2992_v19 = vld [vmem:[#allocation2 + $0x10] sm:$0xf] }
 0x152   : > { %v4913_v13 = vsel %vm4653_vm10, %v3815_v12, %v2757_v8  ;;  %v2505_v9 = vshll.u32 %v2485_v6, 16  ;;  %v2511_v35 = vshll.u32 %v4824_v3, 16  ;;  %v2516_v33 = vshrl.u32 %v2487_v7, 16 }
 0x153   : > { %v2762_v25 = vsel %vm4653_vm10, %v3816_v50, %v2761_v29  ;;  %v2504_v58 = vrot.slane %v2502_v24, 4  ;;  %v2519_v23 = vshll.u32 %v2487_v7, 16  ;;  %v3788_v52 = vcombine.low %v4902_v32, %v4909_v38  ;;  %v2994_v32 = vld [vmem:[#allocation2 + $0x18] sm:$0xf]  ;;  %v4951_v38 = vld [vmem:[#allocation2 + $0x1c] sm:$0x1] }
 0x154   : > { %4114 = vmatmul.mubr.msk.bf16.gmra.mxu0 %vm320_vm1, %v4240_v53  ;;  %v3822_v51 = vcombine.low %v4913_v13, %v2762_v25  ;;  %v2507_v59 = vrot.slane %v2505_v9, 5  ;;  %v2525_v3 = vshll.u32 %v4833_v4, 16  ;;  %v2518_v30 = vrot.slane %v2516_v33, 4  ;;  %v4956_v13 = vld [vmem:[%s5213_s5] sm:$0xf] }
 0x155   : > { %4100 = vmatmul.mubr.msk.bf16.vlgmr.msra.gmra.mxu1 %vm320_vm1, %v3786_v5  ;;  %4129 = vmatprep.mubr.msk.bf16.mxu0 %vm320_vm1, %v3820_v46  ;;  %v2521_v60 = vrot.slane %v2519_v23, 5  ;;  %v3817_v63 = vrot.slane %v2721_v10, 9  ;;  %v2765_v0 = vrot.slane %v4905_v40, 5  ;;  %v2513_v26 = vrot.slane %v2511_v35, 5 }
 0x156   : > { %4118 = vmatpush3.bf16.msra.mxu1 %v4691_v28  ;;  %4103 = vmatprep.mubr.msk.bf16.mxu1 %vm320_vm1, %v3787_v11  ;;  %v2508_v1 = vor.u32 %v2507_v59, %v2504_v58  ;;  %v3818_v27 = vrot.slane %v2722_v61, 9  ;;  %v2769_v4 = vrot.slane %v4916_v37, 5  ;;  %v2527_v62 = vrot.slane %v2525_v3, 5  ;;  %v4942_v11 = vld [vmem:[#allocation2 + $0x14] sm:$0x1] }
 0x157   : > { %v2522_v34 = vor.u32 %v2521_v60, %v2518_v30  ;;  %4195 = vmatprep.subr.msk.bf16.mxu1 %vm333_vm0, %v4724_v45  ;;  %v2530_v5 = vshrl.u32 %v2489_v55, 16  ;;  %v2533_v46 = vshll.u32 %v2489_v55, 16  ;;  %v4935_v2 = vsel %vm4653_vm10, %v3817_v63, %v2765_v0  ;;  %v2493_v58 = vld [vmem:[#allocation2 + $0x28] sm:$0xf]  ;;  %v2495_v59 = vld [vmem:[#allocation2 + $0x30] sm:$0xf] }
 0x158   : > { %v2509_v48 = vrot.slane %v2508_v1, 4  ;;  %v4939_v28 = vsel %vm4653_vm10, %v3818_v27, %v2769_v4  ;;  %v2544_v54 = vshrl.u32 %v2491_v15, 16  ;;  %v2539_v53 = vshll.u32 %v4845_v57, 16 }
 0x159   : > { %v2523_v6 = vrot.slane %v2522_v34, 4  ;;  %v2532_v17 = vrot.slane %v2530_v5, 4  ;;  %v2535_v31 = vrot.slane %v2533_v46, 5  ;;  %v3823_v12 = vcombine.low %v4935_v2, %v4939_v28  ;;  %v4978_v2 = vld [vmem:[%s5211_s3 + $0x20] sm:$0xf] }
 0x15a   : > { %v2514_v45 = vsel %vm4368_vm4, %v2509_v48, %v2513_v26  ;;  %v2546_v8 = vrot.slane %v2544_v54, 4  ;;  %v2547_v7 = vshll.u32 %v2491_v15, 16  ;;  %v2553_v24 = vshll.u32 %v4847_v49, 16  ;;  %v2998_v48 = vld [vmem:[#allocation2 + $0x28] sm:$0xf] }
 0x15b   : > { %v2528_v50 = vsel %vm4368_vm4, %v2523_v6, %v2527_v62  ;;  %v2536_v29 = vor.u32 %v2535_v31, %v2532_v17  ;;  %v3009_v57 = vshrl.u32 %v2992_v19, 16  ;;  %v3012_v10 = vshll.u32 %v2992_v19, 16  ;;  %v4980_v17 = vld [vmem:[#allocation2 + $0x24] sm:$0x1] }
 0x15c   : > { %4130 = vmatmul.mubr.msk.bf16.vlgmr.msra.gmra.mxu0 %vm320_vm1, %v3821_v21  ;;  %v3803_v9 = vcombine.low %v2514_v45, %v2528_v50  ;;  %v2549_v35 = vrot.slane %v2547_v7, 5  ;;  %v3018_v25 = vshll.u32 %v4942_v11, 16  ;;  %v2541_v33 = vrot.slane %v2539_v53, 5 }
 0x15d   : > { %4104 = vmatmul.mubr.msk.bf16.gmra.mxu1 %vm320_vm1, %v3788_v52  ;;  %4133 = vmatprep.mubr.msk.bf16.mxu0 %vm320_vm1, %v3822_v51  ;;  %v2537_v49 = vrot.slane %v2536_v29, 4  ;;  %v3011_v23 = vrot.slane %v3009_v57, 4  ;;  %v3023_v61 = vshrl.u32 %v2994_v32, 16  ;;  %v2555_v20 = vrot.slane %v2553_v24, 5 }
 0x15e   : > { %4119 = vmatprep.mubr.msk.bf16.mxu1 %vm320_vm1, %v3803_v9  ;;  %v2550_v18 = vor.u32 %v2549_v35, %v2546_v8  ;;  %v3014_v21 = vrot.slane %v3012_v10, 5  ;;  %v3026_v3 = vshll.u32 %v2994_v32, 16  ;;  %4148 = vmatpush3.bf16.msra.mxu0 %v4747_v16  ;;  %v3020_v55 = vrot.slane %v3018_v25, 5  ;;  %v2996_v16 = vld [vmem:[#allocation2 + $0x20] sm:$0xf] }
 0x15f   : > { %v3025_v30 = vrot.slane %v3023_v61, 4  ;;  %v3032_v60 = vshll.u32 %v4951_v38, 16  ;;  %v2558_v52 = vshrl.u32 %v2493_v58, 16  ;;  %4198 = vmatprep.subr.msk.bf16.mxu0 %vm333_vm0, %v4956_v13  ;;  %v2561_v15 = vshll.u32 %v2493_v58, 16  ;;  %v4986_v8 = vld [vmem:[#allocation2 + $0x2c] sm:$0x1] }
 0x160   : > { %v2551_v51 = vrot.slane %v2550_v18, 4  ;;  %v3015_v63 = vor.u32 %v3014_v21, %v3011_v23  ;;  %v3028_v0 = vrot.slane %v3026_v3, 5  ;;  %v2542_v1 = vsel %vm4368_vm4, %v2537_v49, %v2541_v33  ;;  %v2497_v9 = vld [vmem:[#allocation2 + $0x38] sm:$0xf]  ;;  %v2499_v49 = vld [vmem:[#allocation2 + $0x40] sm:$0xf] }
 0x161   : > { %v2560_v26 = vrot.slane %v2558_v52, 4  ;;  %v2567_v27 = vshll.u32 %v4867_v14, 16  ;;  %v2572_v4 = vshrl.u32 %v2495_v59, 16  ;;  %v2563_v46 = vrot.slane %v2561_v15, 5 }
 0x162   : > { %v2556_v34 = vsel %vm4368_vm4, %v2551_v51, %v2555_v20  ;;  %v3016_v62 = vrot.slane %v3015_v63, 4  ;;  %v3029_v5 = vor.u32 %v3028_v0, %v3025_v30  ;;  %v3034_v54 = vrot.slane %v3032_v60, 5  ;;  %v3000_v51 = vld [vmem:[#allocation2 + $0x30] sm:$0xf] }
 0x163   : > { %v3804_v28 = vcombine.low %v2542_v1, %v2556_v34  ;;  %v2574_v19 = vrot.slane %v2572_v4, 4  ;;  %v2575_v6 = vshll.u32 %v2495_v59, 16  ;;  %v2564_v53 = vor.u32 %v2563_v46, %v2560_v26  ;;  %v3002_v26 = vld [vmem:[#allocation2 + $0x38] sm:$0xf] }
 0x164   : > { %4134 = vmatmul.mubr.msk.bf16.gmra.mxu0 %vm320_vm1, %v3823_v12  ;;  %v3021_v14 = vsel %vm4368_vm4, %v3016_v62, %v3020_v55  ;;  %v3030_v31 = vrot.slane %v3029_v5, 4  ;;  %v2581_v45 = vshll.u32 %v4873_v36, 16  ;;  %v3037_v32 = vshrl.u32 %v2996_v16, 16 }
 0x165   : > { %4120 = vmatmul.mubr.msk.bf16.vlgmr.msra.gmra.mxu1 %vm320_vm1, %v3804_v28  ;;  %v2577_v7 = vrot.slane %v2575_v6, 5  ;;  %v3040_v50 = vshll.u32 %v2996_v16, 16  ;;  %v4992_v29 = vrot.slane %v3113_v22, 4  ;;  %v2565_v24 = vrot.slane %v2564_v53, 4 }
 0x166   : > { %4138 = vmatpush3.bf16.msra.mxu1 %v4739_v39  ;;  %v3035_v12 = vsel %vm4368_vm4, %v3030_v31, %v3034_v54  ;;  %v2569_v57 = vrot.slane %v2567_v27, 5  ;;  %v3051_v36 = vshrl.u32 %v2998_v48, 16  ;;  %v3039_v25 = vrot.slane %v3037_v32, 4 }
 0x167   : > { %v3838_v35 = vcombine.low %v3021_v14, %v3035_v12  ;;  %v2578_v10 = vor.u32 %v2577_v7, %v2574_v19  ;;  %v3042_v58 = vrot.slane %v3040_v50, 5  ;;  %4197 = vmatprep.subr.msk.bf16.mxu1 %vm333_vm0, %v4978_v2  ;;  %v2583_v42 = vrot.slane %v2581_v45, 5  ;;  %v5015_v19 = vld [vmem:[#allocation2 + $0x34] sm:$0x1]  ;;  %v3004_v45 = vld [vmem:[#allocation2 + $0x40] sm:$0xf] }
 0x168   : > { %v3046_v47 = vshll.u32 %v4980_v17, 16  ;;  %v3053_v22 = vrot.slane %v3051_v36, 4  ;;  %v3054_v39 = vshll.u32 %v2998_v48, 16  ;;  %v3060_v61 = vshll.u32 %v4986_v8, 16  ;;  %v5019_v12 = vld [vmem:[#allocation2 + $0x3c] sm:$0x1] }
 0x169   : > { %4149 = vmatprep.mubr.msk.bf16.mxu0 %vm320_vm1, %v3838_v35  ;;  %v2579_v33 = vrot.slane %v2578_v10, 4  ;;  %v3043_v23 = vor.u32 %v3042_v58, %v3039_v25  ;;  %v2586_v59 = vshrl.u32 %v2497_v9, 16  ;;  %v2589_v20 = vshll.u32 %v2497_v9, 16  ;;  %v5024_v35 = vld [vmem:[#allocation2 + $0x44] sm:$0x1] }
 0x16a   : > { %v3056_v18 = vrot.slane %v3054_v39, 5  ;;  %v2600_v21 = vshrl.u32 %v2499_v49, 16  ;;  %v5004_v3 = vrot.slane %v3116_v44, 5  ;;  %v2570_v55 = vsel %vm4368_vm4, %v2565_v24, %v2569_v57 }
 0x16b   : > { %v2584_v30 = vsel %vm4368_vm4, %v2579_v33, %v2583_v42  ;;  %v3044_v60 = vrot.slane %v3043_v23, 4  ;;  %v2588_v52 = vrot.slane %v2586_v59, 4  ;;  %v3048_v0 = vrot.slane %v3046_v47, 5 }
 0x16c   : > { %v3805_v63 = vcombine.low %v2570_v55, %v2584_v30  ;;  %v3057_v15 = vor.u32 %v3056_v18, %v3053_v22  ;;  %v2591_v1 = vrot.slane %v2589_v20, 5  ;;  %v3062_v27 = vrot.slane %v3060_v61, 5 }
 0x16d   : > { %v2595_v4 = vshll.u32 %v4905_v40, 16  ;;  %v2602_v16 = vrot.slane %v2600_v21, 4  ;;  %v2603_v44 = vshll.u32 %v2499_v49, 16  ;;  %v3065_v5 = vshrl.u32 %v3000_v51, 16  ;;  %v4241_v21 = vld [vmem:[#allocation2 + $0x10] ss:$8 sps:$4 sm:$0xff]  }
 0x16e   : > { %4123 = vmatprep.mubr.msk.bf16.mxu1 %vm320_vm1, %v3805_v63  ;;  %v3058_v34 = vrot.slane %v3057_v15, 4  ;;  %v2592_v62 = vor.u32 %v2591_v1, %v2588_v52  ;;  %v3068_v46 = vshll.u32 %v3000_v51, 16  ;;  %v3049_v48 = vsel %vm4368_vm4, %v3044_v60, %v3048_v0 }
 0x16f   : > { %v2605_v28 = vrot.slane %v2603_v44, 5  ;;  %v2609_v54 = vshll.u32 %v4916_v37, 16  ;;  %v3079_v6 = vshrl.u32 %v3002_v26, 16  ;;  %v3067_v31 = vrot.slane %v3065_v5, 4  ;;  %v4242_v44 = vld [vmem:[#allocation2 + $0x20] ss:$8 sps:$4 sm:$0xff]  }
 0x170   : > { %v3063_v40 = vsel %vm4368_vm4, %v3058_v34, %v3062_v27  ;;  %v2593_v14 = vrot.slane %v2592_v62, 4  ;;  %v3070_v53 = vrot.slane %v3068_v46, 5  ;;  %v2597_v32 = vrot.slane %v2595_v4, 5  ;;  %v4245_v27 = vld [vmem:[%s4326_s12 + $0xd8] ss:$8 sps:$4 sm:$0xff]  }
 0x171   : > { %v3839_v7 = vcombine.low %v3049_v48, %v3063_v40  ;;  %v2606_v50 = vor.u32 %v2605_v28, %v2602_v16  ;;  %v3444_v24 = vsel %vm333_vm0, %v4956_v13, 0  ;;  %v3074_v37 = vshll.u32 %v5015_v19, 16  ;;  %v3222_v16 = vld [vmem:[#allocation2 + $0x10] sm:$0xe]  ;;  %v3223_v34 = vld [vmem:[#allocation2 + $0x18] sm:$0xe] }
 0x172   : > { %v3071_v57 = vor.u32 %v3070_v53, %v3067_v31  ;;  %v3081_v36 = vrot.slane %v3079_v6, 4  ;;  %v3082_v9 = vshll.u32 %v3002_v26, 16  ;;  %v2611_v25 = vrot.slane %v2609_v54, 5  ;;  %v4246_v48 = vld [vmem:[%s4326_s12 + $0xe8] ss:$8 sps:$4 sm:$0xff]  }
 0x173   : > { %4150 = vmatmul.mubr.msk.bf16.vlgmr.msra.gmra.mxu0 %vm320_vm1, %v3839_v7  ;;  %v2607_v10 = vrot.slane %v2606_v50, 4  ;;  %v3093_v58 = vshrl.u32 %v3004_v45, 16  ;;  %v3096_v49 = vshll.u32 %v3004_v45, 16  ;;  %v2598_v42 = vsel %vm4368_vm4, %v2593_v14, %v2597_v32  ;;  %v4247_v28 = vld [vmem:[%s4326_s12 + $0xf8] ss:$8 sps:$4 sm:$0xff]  }
 0x174   : > { %v3072_v47 = vrot.slane %v3071_v57, 4  ;;  %v3084_v22 = vrot.slane %v3082_v9, 5  ;;  %v3088_v13 = vshll.u32 %v5019_v12, 16  ;;  %4168 = vmatpush3.bf16.msra.mxu0 %v3444_v24  ;;  %v3102_v61 = vshll.u32 %v5024_v35, 16  ;;  %v3225_v54 = vld [vmem:[#allocation2 + $0x28] sm:$0xe] }
 0x175   : > { %v2612_v39 = vsel %vm4368_vm4, %v2607_v10, %v2611_v25  ;;  %v3095_v33 = vrot.slane %v3093_v58, 4  ;;  %v3098_v23 = vrot.slane %v3096_v49, 5  ;;  %v3076_v18 = vrot.slane %v3074_v37, 5  ;;  %v3226_v6 = vld [vmem:[#allocation2 + $0x30] sm:$0xe] }
 0x176   : > { %v3806_v59 = vcombine.low %v2598_v42, %v2612_v39  ;;  %v3085_v20 = vor.u32 %v3084_v22, %v3081_v36  ;;  %v3090_v52 = vrot.slane %v3088_v13, 5  ;;  %v3104_v63 = vrot.slane %v3102_v61, 5  ;;  %v4244_v40 = vld [vmem:[#allocation2 + $0x40] ss:$8 sps:$4 sm:$0xff]  }
 0x177   : > { %v3099_v55 = vor.u32 %v3098_v23, %v3095_v33  ;;  %v3077_v30 = vsel %vm4368_vm4, %v3072_v47, %v3076_v18  ;;  %v3119_v0 = vsel %vm4368_vm4, %v4992_v29, %v5004_v3  ;;  %v3305_v29 = vsel %vm333_vm0, %v4978_v2, 0  ;;  %v4243_v3 = vld [vmem:[#allocation2 + $0x30] ss:$8 sps:$4 sm:$0xff]   ;;  %v3229_v9 = vld [vmem:[#allocation2 + $0x48] sm:$0xe] }
 0x178   : > { %4124 = vmatmul.mubr.msk.bf16.gmra.mxu1 %vm320_vm1, %v3806_v59  ;;  %v3086_v60 = vrot.slane %v3085_v20, 4  ;;  %v3846_v43 = vrot.slane %v3222_v16, 9  ;;  %v3248_v62 = vrot.slane %v4942_v11, 5  ;;  %v3847_v5 = vrot.slane %v3223_v34, 9  ;;  %v3224_v11 = vld [vmem:[#allocation2 + $0x20] sm:$0xe] }
 0x179   : > { %4139 = vmatprep.mubr.msk.bf16.mxu1 %vm320_vm1, %v4241_v21  ;;  %v3100_v51 = vrot.slane %v3099_v55, 4  ;;  %v3252_v46 = vrot.slane %v4951_v38, 5  ;;  %v3849_v53 = vrot.slane %v3225_v54, 9  ;;  %v3260_v45 = vrot.slane %v4986_v8, 5  ;;  %v3227_v38 = vld [vmem:[#allocation2 + $0x38] sm:$0xe] }
 0x17a   : > { %v3091_v15 = vsel %vm4368_vm4, %v3086_v60, %v3090_v52  ;;  %v3249_v2 = vsel %vm4653_vm10, %v3846_v43, %v3248_v62  ;;  %v3850_v7 = vrot.slane %v3226_v6, 9  ;;  %v3264_v32 = vrot.slane %v5015_v19, 5  ;;  %v4248_v36 = vld [vmem:[%s4326_s12 + $0x108] ss:$8 sps:$4 sm:$0xff]   ;;  %v3228_v25 = vld [vmem:[#allocation2 + $0x40] sm:$0xe] }
 0x17b   : > { %v3840_v1 = vcombine.low %v3077_v30, %v3091_v15  ;;  %v3105_v26 = vsel %vm4368_vm4, %v3100_v51, %v3104_v63  ;;  %v3253_v14 = vsel %vm4653_vm10, %v3847_v5, %v3252_v46  ;;  %v3848_v50 = vrot.slane %v3224_v11, 9 }
 0x17c   : > { %v3841_v4 = vcombine.low %v3105_v26, %v3119_v0  ;;  %v3855_v31 = vcombine.low %v3249_v2, %v3253_v14  ;;  %v3256_v24 = vrot.slane %v4980_v17, 5  ;;  %v3851_v57 = vrot.slane %v3227_v38, 9 }
 0x17d   : > { %4153 = vmatprep.mubr.msk.bf16.mxu0 %vm320_vm1, %v3840_v1  ;;  %v3268_v37 = vrot.slane %v5019_v12, 5  ;;  %v3261_v8 = vsel %vm4653_vm10, %v3849_v53, %v3260_v45  ;;  %v3265_v10 = vsel %vm4653_vm10, %v3850_v7, %v3264_v32  ;;  %v3853_v17 = vrot.slane %v3229_v9, 9 }
 0x17e   : > { %4154 = vmatmul.mubr.msk.bf16.gmra.mxu0 %vm320_vm1, %v3841_v4  ;;  %v3257_v19 = vsel %vm4653_vm10, %v3848_v50, %v3256_v24  ;;  %v3852_v42 = vrot.slane %v3228_v25, 9  ;;  %v3272_v47 = vrot.slane %v5024_v35, 5  ;;  %v3276_v22 = vrot.slane %v4819_v56, 5 }
 0x17f   : > { %4169 = vmatprep.mubr.msk.bf16.mxu0 %vm320_vm1, %v4245_v27  ;;  %v3856_v58 = vcombine.low %v3257_v19, %v3261_v8  ;;  %v3269_v49 = vsel %vm4653_vm10, %v3851_v57, %v3268_v37 }
 0x180   : > { %4140 = vmatmul.mubr.msk.bf16.vlgmr.msra.gmra.mxu1 %vm320_vm1, %v4242_v44  ;;  %v3857_v12 = vcombine.low %v3265_v10, %v3269_v49  ;;  %v3273_v13 = vsel %vm4653_vm10, %v3852_v42, %v3272_v47  ;;  %v3277_v39 = vsel %vm4653_vm10, %v3853_v17, %v3276_v22 }
 0x181   : > { %4158 = vmatpush3.bf16.msra.mxu1 %v3305_v29  ;;  %4143 = vmatprep.mubr.msk.bf16.mxu1 %vm320_vm1, %v4243_v3  ;;  %v3858_v33 = vcombine.low %v3273_v13, %v3277_v39 }
 0x186   : > { %4170 = vmatmul.mubr.msk.bf16.vlgmr.msra.gmra.mxu0 %vm320_vm1, %v4246_v48 }
 0x187   : > { %4173 = vmatprep.mubr.msk.bf16.mxu0 %vm320_vm1, %v4247_v28 }
 0x188   : > { %4144 = vmatmul.mubr.msk.bf16.gmra.mxu1 %vm320_vm1, %v4244_v40 }
 0x189   : > { %4159 = vmatprep.mubr.msk.bf16.mxu1 %vm320_vm1, %v3855_v31 }
 0x18e   : > { %4174 = vmatmul.mubr.msk.bf16.gmra.mxu0 %vm320_vm1, %v4248_v36 }
 0x190   : > { %4160 = vmatmul.mubr.msk.bf16.vlgmr.msra.gmra.mxu1 %vm320_vm1, %v3856_v58 }
 0x191   : > { %4163 = vmatprep.mubr.msk.bf16.mxu1 %vm320_vm1, %v3857_v12 }
 0x198   : > { %4164 = vmatmul.mubr.msk.bf16.gmra.mxu1 %vm320_vm1, %v3858_v33 }
 0x1f8   : > { %v4091_v23 = vpop.f32.mrf.mxu0 }
 0x1fa   : > { %v2175_v61 = vpop.f32.mrf.mxu0 }
 0x1fc   : > { %v4092_v59 = vpop.f32.mrf.mxu0 }
 0x1fe   : > { %v2178_v18 = vpop.f32.mrf.mxu0 }
 0x204   : > { %v4095_v35 = vpop.f32.mrf.mxu0  ;;  %v4081_v20 = vpop.f32.mrf.mxu1 }
 0x205   : > { %v2184_v10 = vadd.f32 %v4091_v23, %v4081_v20 }
 0x206   : > { %v5088_v56 = vpop.f32.mrf.mxu0  ;;  %v2075_v21 = vpop.f32.mrf.mxu1 }
 0x207   : > { %v2176_v58 = vadd.f32 %v2175_v61, %v2075_v21 }
 0x208   : > { %v5090_v55 = vpop.f32.mrf.mxu0  ;;  %v4082_v30 = vpop.f32.mrf.mxu1 }
 0x209   : > { %v2187_v42 = vadd.f32 %v4092_v59, %v4082_v30 }
 0x20a   : > { %v5092_v60 = vpop.f32.mrf.mxu0  ;;  %v2078_v52 = vpop.f32.mrf.mxu1 }
 0x20b   : > { %v2179_v39 = vadd.f32 %v2178_v18, %v2078_v52 }
 0x20c   : > { %v4111_v41 = vpop.f32.mrf.mxu0 }
 0x20d   : > { %v4085_v51 = vpop.f32.mrf.mxu1 }
 0x20e   : > { %v2446_v63 = vpop.f32.mrf.mxu0 }
 0x20f   : > { %v2091_v0 = vpop.f32.mrf.mxu1 }
 0x210   : > { %v4112_v15 = vpop.f32.mrf.mxu0  ;;  %v2192_v61 = vadd.f32 %v5088_v56, %v2091_v0 }
 0x211   : > { %v4086_v1 = vpop.f32.mrf.mxu1 }
 0x212   : > { %v5094_v26 = vpop.f32.mrf.mxu0 }
 0x213   : > { %v5096_v27 = vpop.f32.mrf.mxu1 }
 0x214   : > { %v5098_v4 = vpop.f32.mrf.mxu0 }
 0x215   : > { %v4101_v16 = vpop.f32.mrf.mxu1 }
 0x216   : > { %v5100_v44 = vpop.f32.mrf.mxu0  ;;  %v2361_v49 = vadd.f32 %v4101_v16, %v2184_v10 }
 0x217   : > { %v2328_v29 = vpop.f32.mrf.mxu1 }
 0x218   : > { %v5102_v3 = vpop.f32.mrf.mxu0  ;;  %v2359_v47 = vadd.f32 %v2328_v29, %v2176_v58  ;;  %v2203_v29 = vadd.f32 %v5090_v55, %v4086_v1 }
 0x219   : > { %v4102_v34 = vpop.f32.mrf.mxu1 }
 0x21a   : > { %v5104_v43 = vpop.f32.mrf.mxu0  ;;  %v2362_v33 = vadd.f32 %v4102_v34, %v2187_v42  ;;  %v2195_v34 = vadd.f32 %v5092_v60, %v5096_v27  ;;  %v5146_v60 = vld [vmem:[%s5214_s6] ss:$0 sm:$0xff] }
 0x21b   : > { %v2331_v62 = vpop.f32.mrf.mxu1 }
 0x21c   : > { %v4131_v5 = vpop.f32.mrf.mxu0  ;;  %v2360_v20 = vadd.f32 %v2331_v62, %v2179_v39  ;;  %v2480_v30 = vadd.f32 %v4112_v15, %v2362_v33 }
 0x21d   : > { %v4105_v46 = vpop.f32.mrf.mxu1 }
 0x21e   : > { %v2834_v48 = vpop.f32.mrf.mxu0 }
 0x21f   : > { %v2344_v28 = vpop.f32.mrf.mxu1 }
 0x220   : > { %v5106_v2 = vpop.f32.mrf.mxu0  ;;  %v2363_v58 = vadd.f32 %v2344_v28, %v2192_v61 }
 0x221   : > { %v4106_v54 = vpop.f32.mrf.mxu1 }
 0x222   : > { %v5108_v6 = vpop.f32.mrf.mxu0  ;;  %v2481_v1 = vadd.f32 %v5100_v44, %v2363_v58 }
 0x223   : > { %v2347_v40 = vpop.f32.mrf.mxu1 }
 0x224   : > { %v5110_v14 = vpop.f32.mrf.mxu0 }
 0x225   : > { %v4121_v31 = vpop.f32.mrf.mxu1 }
 0x226   : > { %v5112_v11 = vpop.f32.mrf.mxu0 }
 0x227   : > { %v2676_v45 = vpop.f32.mrf.mxu1 }
 0x228   : > { %v5114_v53 = vpop.f32.mrf.mxu0 }
 0x229   : > { %5229 = vst [vmem:[#allocation4_spill] sm:$0xff] %v5114_v53  ;;  %v4122_v7 = vpop.f32.mrf.mxu1 }
 0x22a   : > { %v5116_v38 = vpop.f32.mrf.mxu0 }
 0x22b   : > { %5230 = vst [vmem:[#allocation3_spill] sm:$0xff] %v5116_v38  ;;  %v2679_v50 = vpop.f32.mrf.mxu1  ;;  %v2479_v38 = vadd.f32 %v4111_v41, %v2361_v49  ;;  %v2710_v41 = vadd.f32 %v4122_v7, %v2480_v30 }
 0x233   : > { %v4151_v32 = vpop.f32.mrf.mxu0 }
 0x235   : > { %v5118_v24 = vpop.f32.mrf.mxu0 }
 0x237   : > { %v5120_v57 = vpop.f32.mrf.mxu0 }
 0x238   : > { %5231 = vst [vmem:[#allocation5_spill] sm:$0xff] %v5120_v57  ;;  %v4125_v37 = vpop.f32.mrf.mxu1  ;;  %v2709_v57 = vadd.f32 %v4121_v31, %v2479_v38 }
 0x239   : > { %v5122_v8 = vpop.f32.mrf.mxu0 }
 0x23a   : > { %v2692_v36 = vpop.f32.mrf.mxu1  ;;  %5232 = vst [vmem:[#allocation6_spill] sm:$0xff] %v5122_v8  ;;  %v2200_v8 = vadd.f32 %v4095_v35, %v4085_v51  ;;  %v2478_v35 = vadd.f32 %v5094_v26, %v2360_v20  ;;  %v2867_v51 = vadd.f32 %v4131_v5, %v2709_v57  ;;  %v2868_v26 = vadd.f32 %v5106_v2, %v2710_v41 }
 0x23b   : > { %v2711_v5 = vadd.f32 %v2692_v36, %v2481_v1 }
 0x23c   : > { %v4126_v9 = vpop.f32.mrf.mxu1  ;;  %v2365_v21 = vadd.f32 %v4105_v46, %v2200_v8  ;;  %v2708_v46 = vadd.f32 %v2679_v50, %v2478_v35 }
 0x23e   : > { %v5124_v25 = vpop.f32.mrf.mxu1  ;;  %v5126_v19 = vpop.f32.mrf.mxu0  ;;  %v2483_v56 = vadd.f32 %v5098_v4, %v2365_v21 }
 0x23f   : > { %5233 = vst [vmem:[#allocation7_spill] sm:$0xff] %v5126_v19  ;;  %v2477_v19 = vadd.f32 %v2446_v63, %v2359_v47  ;;  %v2366_v63 = vadd.f32 %v4106_v54, %v2203_v29 }
 0x240   : > { %v4141_v17 = vpop.f32.mrf.mxu1  ;;  %v5128_v12 = vpop.f32.mrf.mxu0  ;;  %v2713_v55 = vadd.f32 %v4125_v37, %v2483_v56 }
 0x241   : > { %v2707_v59 = vadd.f32 %v2676_v45, %v2477_v19  ;;  %v2986_v31 = vadd.f32 %v4141_v17, %v2867_v51  ;;  %v2364_v45 = vadd.f32 %v2347_v40, %v2195_v34  ;;  %v2484_v7 = vadd.f32 %v5102_v3, %v2366_v63  ;;  %v5154_v3 = vld [vmem:[%s5212_s4] ss:$0 sm:$0xff]  ;;  %v5236_v21 = vld [vmem:[#allocation6_spill] sm:$0xff] }
 0x242   : > { %v2953_v22 = vpop.f32.mrf.mxu1  ;;  %v5130_v13 = vpop.f32.mrf.mxu0  ;;  %v2871_v2 = vadd.f32 %v5110_v14, %v2713_v55  ;;  %v5234_v17 = vld [vmem:[#allocation5_spill] sm:$0xff] }
 0x243   : > { %v2865_v15 = vadd.f32 %v2834_v48, %v2707_v59  ;;  %v2866_v48 = vadd.f32 %v5108_v6, %v2708_v46  ;;  %v3216_v40 = vadd.f32 %v4151_v32, %v2986_v31  ;;  %v2714_v44 = vadd.f32 %v4126_v9, %v2484_v7 }
 0x244   : > { %v4142_v53 = vpop.f32.mrf.mxu1  ;;  %v5132_v23 = vpop.f32.mrf.mxu0  ;;  %v2482_v50 = vadd.f32 %v5104_v43, %v2364_v45  ;;  %v2869_v9 = vadd.f32 %v5112_v11, %v2711_v5 }
 0x245   : > { %v2984_v38 = vadd.f32 %v2953_v22, %v2865_v15  ;;  %v2987_v54 = vadd.f32 %v4142_v53, %v2868_v26  ;;  %v5235_v22 = vld [vmem:[#allocation4_spill] sm:$0xff] }
 0x246   : > { %v2956_v16 = vpop.f32.mrf.mxu1  ;;  %v4171_v10 = vpop.f32.mrf.mxu0  ;;  %v2712_v6 = vadd.f32 %v5124_v25, %v2482_v50  ;;  %v2872_v39 = vadd.f32 %v5235_v22, %v2714_v44 }
 0x247   : > { %v2985_v37 = vadd.f32 %v2956_v16, %v2866_v48  ;;  %v3489_v36 = vadd.f32 %v4171_v10, %v5146_v60  ;;  %v3214_v53 = vadd.f32 %v5118_v24, %v2984_v38  ;;  %v3217_v42 = vadd.f32 %v5234_v17, %v2987_v54  ;;  %v5237_v10 = vld [vmem:[#allocation3_spill] sm:$0xff] }
 0x248   : > { %v4145_v18 = vpop.f32.mrf.mxu1  ;;  %v3480_v52 = vpop.f32.mrf.mxu0  ;;  %v2870_v59 = vadd.f32 %v5237_v10, %v2712_v6 }
 0x249   : > { %v2990_v32 = vadd.f32 %v4145_v18, %v2871_v2  ;;  %v3481_v33 = vadd.f32 %v5146_v60, %v3480_v52  ;;  %v3215_v11 = vadd.f32 %v5236_v21, %v2985_v37  ;;  %v5238_v18 = vld [vmem:[#allocation7_spill] sm:$0xff] }
 0x24a   : > { %v2969_v0 = vpop.f32.mrf.mxu1  ;;  %v4172_v62 = vpop.f32.mrf.mxu0 }
 0x24b   : > { %v2988_v47 = vadd.f32 %v2969_v0, %v2869_v9  ;;  %v3492_v30 = vadd.f32 %v4172_v62, %v5146_v60  ;;  %v3220_v52 = vadd.f32 %v5238_v18, %v2990_v32 }
 0x24c   : > { %v4146_v28 = vpop.f32.mrf.mxu1  ;;  %v3483_v4 = vpop.f32.mrf.mxu0 }
 0x24d   : > { %v2991_v16 = vadd.f32 %v4146_v28, %v2872_v39  ;;  %v3484_v56 = vadd.f32 %v5146_v60, %v3483_v4  ;;  %v3218_v31 = vadd.f32 %v5128_v12, %v2988_v47 }
 0x24e   : > { %v2972_v27 = vpop.f32.mrf.mxu1  ;;  %v4175_v19 = vpop.f32.mrf.mxu0 }
 0x24f   : > { %v2989_v63 = vadd.f32 %v2972_v27, %v2870_v59  ;;  %v3505_v0 = vadd.f32 %v4175_v19, %v5146_v60  ;;  %v3221_v38 = vadd.f32 %v5130_v13, %v2991_v16 }
 0x250   : > { %v4161_v57 = vpop.f32.mrf.mxu1  ;;  %v3496_v58 = vpop.f32.mrf.mxu0 }
 0x251   : > { %v3374_v8 = vadd.f32 %v4161_v57, %v3216_v40  ;;  %v3497_v27 = vadd.f32 %v5146_v60, %v3496_v58  ;;  %v3219_v54 = vadd.f32 %v5132_v23, %v2989_v63 }
 0x252   : > { %v3341_v43 = vpop.f32.mrf.mxu1  ;;  %v4176_v1 = vpop.f32.mrf.mxu0 }
 0x253   : > { %v3389_v14 = vadd.f32 %v5154_v3, %v3374_v8  ;;  %v3372_v49 = vadd.f32 %v3341_v43, %v3214_v53  ;;  %v3508_v50 = vadd.f32 %v4176_v1, %v5146_v60 }
 0x254   : > { %v4162_v20 = vpop.f32.mrf.mxu1  ;;  %v3499_v2 = vpop.f32.mrf.mxu0 }
 0x255   : > { %v3513_v24 = vadd.f32 %v3489_v36, %v3389_v14  ;;  %v3387_v25 = vadd.f32 %v5154_v3, %v3372_v49  ;;  %v3375_v61 = vadd.f32 %v4162_v20, %v3217_v42  ;;  %v3500_v6 = vadd.f32 %v5146_v60, %v3499_v2 }
 0x256   : > { %v3344_v29 = vpop.f32.mrf.mxu1 }
 0x257   : > { %v3521_v41 = vmax.f32 %v3513_v24, 0.0  ;;  %v3511_v35 = vadd.f32 %v3481_v33, %v3387_v25  ;;  %v3390_v51 = vadd.f32 %v5154_v3, %v3375_v61  ;;  %v3373_v34 = vadd.f32 %v3344_v29, %v3215_v11 }
 0x258   : > { %v4165_v46 = vpop.f32.mrf.mxu1 }
 0x259   : > { %3529 = vst.msk [vmem:[%s5171_s11 + $0x10] sm:$0xff] %vm320_vm1, %v3521_v41  ;;  %v3519_v62 = vmax.f32 %v3511_v35, 0.0  ;;  %v3514_v15 = vadd.f32 %v3492_v30, %v3390_v51  ;;  %v3388_v45 = vadd.f32 %v5154_v3, %v3373_v34  ;;  %v3378_v55 = vadd.f32 %v4165_v46, %v3220_v52 }
 0x25a   : > { %v3357_v28 = vpop.f32.mrf.mxu1 }
 0x25b   : > { %3527 = vst.msk [vmem:[%s5171_s11] sm:$0xff] %vm320_vm1, %v3519_v62  ;;  %v3522_v26 = vmax.f32 %v3514_v15, 0.0  ;;  %v3512_v5 = vadd.f32 %v3484_v56, %v3388_v45  ;;  %v3393_v7 = vadd.f32 %v5154_v3, %v3378_v55  ;;  %v3376_v12 = vadd.f32 %v3357_v28, %v3218_v31 }
 0x25c   : > { %v4166_v4 = vpop.f32.mrf.mxu1 }
 0x25d   : > { %3530 = vst.msk [vmem:[%s5171_s11 + $0x18] sm:$0xff] %vm320_vm1, %v3522_v26  ;;  %v3520_v48 = vmax.f32 %v3512_v5, 0.0  ;;  %v3517_v40 = vadd.f32 %v3505_v0, %v3393_v7  ;;  %v3391_v13 = vadd.f32 %v5154_v3, %v3376_v12  ;;  %v3379_v44 = vadd.f32 %v4166_v4, %v3221_v38 }
 0x25e   : > { %v3360_v57 = vpop.f32.mrf.mxu1 }
 0x25f   : > { %3528 = vst.msk [vmem:[%s5171_s11 + $0x8] sm:$0xff] %vm320_vm1, %v3520_v48  ;;  %v3525_v37 = vmax.f32 %v3517_v40, 0.0  ;;  %v3515_v36 = vadd.f32 %v3497_v27, %v3391_v13  ;;  %v3394_v23 = vadd.f32 %v5154_v3, %v3379_v44  ;;  %v3377_v8 = vadd.f32 %v3360_v57, %v3219_v54 }
 0x261   : > { %3533 = vst.msk [vmem:[%s5171_s11 + $0x30] sm:$0xff] %vm320_vm1, %v3525_v37  ;;  %v3523_v53 = vmax.f32 %v3515_v36, 0.0  ;;  %v3518_v32 = vadd.f32 %v3508_v50, %v3394_v23  ;;  %v3392_v9 = vadd.f32 %v5154_v3, %v3377_v8 }
 0x263   : > { %3531 = vst.msk [vmem:[%s5171_s11 + $0x20] sm:$0xff] %vm320_vm1, %v3523_v53  ;;  %v3526_v43 = vmax.f32 %v3518_v32, 0.0  ;;  %v3516_v19 = vadd.f32 %v3500_v6, %v3392_v9 }
 0x265   : > { %3534 = vst.msk [vmem:[%s5171_s11 + $0x38] sm:$0xff] %vm320_vm1, %v3526_v43  ;;  %v3524_v14 = vmax.f32 %v3516_v19, 0.0 }
 0x267   : > { %3532 = vst.msk [vmem:[%s5171_s11 + $0x28] sm:$0xff] %vm320_vm1, %v3524_v14 }
 0x268 PF: > { %s17_s24 = sadd.s32 1, %s4255_s24  }
 0x269   : > { %p14_p4 = scmp.ge.s32.totalorder %s17_s24, 4  }
 0x26b   :  { %16 = sbr.rel (!%p14_p4) target bundleno = 1 (0x1), region = 101 }

</bundles_post_ra>
